<compile_context>
chip_gen: v5e
topology: v5e:2x2
jax: 0.10.0
libtpu: 0.0.40
codegen_flags: <defaults>
</compile_context>

<pallas_src>
import functools
import math

import jax
import jax.numpy as jnp
from jax.experimental import pallas as pl
from jax.experimental.pallas import tpu as pltpu


# ----------------------------- hardware-aware sizing helpers -----------------------------

def _round_up(x, m):
    return ((x + m - 1) // m) * m


@functools.lru_cache(maxsize=None)
def _vmem_capacity_bytes():
    try:
        cap = getattr(pltpu.get_tpu_info(), "vmem_capacity_bytes", None)
        if cap:
            return int(cap)
    except Exception:
        pass
    try:
        kind = jax.devices()[0].device_kind.lower()
        if "v7" in kind:
            return 64 * 2 ** 20
        return 128 * 2 ** 20            # v5e / v5p / v6e
    except Exception:
        return 64 * 2 ** 20             # safest assumption


@functools.lru_cache(maxsize=None)
def _vmem_limit_bytes():
    # explicit scoped-VMEM limit: ~75% of physical, capped at 100 MiB
    return min(_vmem_capacity_bytes() * 3 // 4, 100 * 2 ** 20)


@functools.lru_cache(maxsize=None)
def _tile_budget_bytes():
    # leave headroom below the explicit limit for compiler temporaries
    return _vmem_limit_bytes() * 3 // 5


@functools.lru_cache(maxsize=None)
def _use_bf16_gates():
    # bf16 EUP/VPU path exists on v6e/v7x; keep f32 gate math on v5e and unknown chips
    try:
        kind = jax.devices()[0].device_kind.lower()
    except Exception:
        return False
    return ("v6" in kind) or ("v7" in kind)


def _nbytes(a):
    return int(a.size) * a.dtype.itemsize


def _tile_bytes(nt, t, c, h):
    io = 2 * 2 * t * nt * c * 4              # x + out blocks, double-buffered
    xg = t * nt * 16 * h * 4                 # f32 gate-preactivation scratch
    hh = t * nt * 4 * h * 2                  # bf16 hidden history
    tmp = t * nt * (16 * h * 4 + 8 * c)      # prologue matmul result + epilogue temps (generous)
    return io + xg + hh + tmp


def _pick_seq_tile(n, t, c, h, max_nt=64):
    """Pick the per-tile sequence count Nt (multiple of 8) and padded N.

    max_nt=64 keeps per-step carries + gate temporaries comfortably under the 64-vreg file
    (vreg-pressure caution from the review); VMEM budget can only shrink it further.
    """
    budget = _tile_budget_bytes()
    n8 = _round_up(n, 8)
    # guarantee >=2 grid steps when there is enough work (v7x has 2 TensorCores)
    cap = n8 if n8 < 16 else _round_up(pl.cdiv(n8, 2), 8)
    nt = max(8, (min(max_nt, cap) // 8) * 8)
    while nt > 8 and _tile_bytes(nt, t, c, h) > budget:
        nt -= 8
    n_pad = _round_up(n8, nt)
    return nt, n_pad


# ----------------------------- fused MulCatBlock kernel -----------------------------

def _mulcat_block_kernel(x_ref, wih_ref, whh_ref, b_ref, proj_wt_ref, proj_b_ref,
                         blk_wt_ref, blk_b_ref, out_ref, xg_ref, hh_ref, *, bf16_gates):
    """Fused MulCatBlock + residual for a tile of sequences (time-major layout).

    x:       (T, Nt, C)   f32   input sequences, channels on lanes
    wih:     (C, 16H)     bf16  combined input weights, gate-major layout
                                [i: rnn_f,gate_f,rnn_b,gate_b | f | g | o] (each sub-block H)
    whh:     (4H, 16H)    bf16  combined recurrent weights, rows = [rnn_f,gate_f,rnn_b,gate_b]
    b:       (1, 16H)     f32   bias_ih + bias_hh, same column layout as wih
    proj_wt: (4H, 2C)     bf16  rnn_proj & gate_proj fused over the packed hidden layout
    proj_b:  (1, 2C)      f32
    blk_wt:  (2C, C)      bf16  block_projection weight^T (rows: [gated | input])
    blk_b:   (1, C)       f32
    out:     (T, Nt, C)   f32   x + MulCatBlock(x)   (fused residual, ByPass normalization)
    scratch: xg (T, Nt, 16H) f32, hh (T, Nt, 4H) bf16
    """
    T, Nt, C = x_ref.shape
    H4, G16 = whh_ref.shape          # 4H hidden lanes, 16H gate lanes
    H2 = H4 // 2                     # 2H: forward half of the fused hidden state
    G4 = G16 // 4                    # 4H: one gate group (i / f / g / o)

    # ---- prologue: input contribution of all four LSTM directions, bias folded once ----
    x_bf = x_ref[...].reshape(T * Nt, C).astype(jnp.bfloat16)
    xg = jnp.dot(x_bf, wih_ref[...], preferred_element_type=jnp.float32) + b_ref[...]
    xg_ref[...] = xg.reshape(T, Nt, G16)

    whh = whh_ref[...]
    # forward-direction columns are the first 2H of every 4H-wide gate group
    col = jax.lax.broadcasted_iota(jnp.int32, (1, G16), 1)
    fwd_mask = (col % G4) < H2
    gate_dtype = jnp.bfloat16 if bf16_gates else jnp.float32

    # ---- fused bidirectional (rnn + gate-rnn) LSTM recurrence, one matmul per step ----
    def body(t, carry):
        h, c = carry                              # h (Nt,4H) bf16, c (Nt,4H) f32
        rt = T - 1 - t
        rec = jnp.dot(h, whh, preferred_element_type=jnp.float32)
        pre = rec + jnp.where(fwd_mask, xg_ref[t], xg_ref[rt])
        g = pre.astype(gate_dtype)
        i_t = jax.nn.sigmoid(g[:, 0 * G4:1 * G4])
        f_t = jax.nn.sigmoid(g[:, 1 * G4:2 * G4])
        g_t = jnp.tanh(g[:, 2 * G4:3 * G4])
        o_t = jax.nn.sigmoid(g[:, 3 * G4:4 * G4])
        c = f_t.astype(jnp.float32) * c + (i_t * g_t).astype(jnp.float32)
        h = (o_t * jnp.tanh(c.astype(gate_dtype))).astype(jnp.bfloat16)
        hh_ref[t, :, :H2] = h[:, :H2]             # forward halves live at position t
        hh_ref[rt, :, H2:] = h[:, H2:]            # backward halves live at position T-1-t
        return h, c

    h0 = jnp.zeros((Nt, H4), jnp.bfloat16)
    c0 = jnp.zeros((Nt, H4), jnp.float32)
    jax.lax.fori_loop(0, T, body, (h0, c0), unroll=True if T <= 16 else 2)

    # ---- epilogue: both Linear projections, gating, block projection and residual ----
    x2d = x_ref[...].reshape(T * Nt, C)
    h_all = hh_ref[...].reshape(T * Nt, H4)       # per position: [rnn_f | gate_f | rnn_b | gate_b]
    proj = jnp.dot(h_all, proj_wt_ref[...],
                   preferred_element_type=jnp.float32) + proj_b_ref[...]
    gated = proj[:, :C] * proj[:, C:]
    cat2 = jnp.concatenate([gated, x2d], axis=-1).astype(jnp.bfloat16)
    out = (jnp.dot(cat2, blk_wt_ref[...], preferred_element_type=jnp.float32)
           + blk_b_ref[...] + x2d)                # fused residual (ByPass norm + eval +=)
    out_ref[...] = out.reshape(T, Nt, C)


def _mulcat_cost(n, t, c, h, fp):
    pos = n * t
    flops = 2 * pos * (c * 16 * h + 4 * h * 16 * h + 4 * h * 2 * c + 2 * c * c)
    trans = pos * 20 * h
    wbytes = sum(_nbytes(v) for v in fp.values())
    return pl.CostEstimate(flops=int(flops), transcendentals=int(trans),
                           bytes_accessed=int(2 * pos * c * 4 + wbytes))


def _mulcat_block(x_tm, fp, bf16_gates):
    """x_tm: (T, N, C) f32 time-major -> (T, N, C) f32 = x + MulCatBlock(x)."""
    T, N, C = x_tm.shape
    H4, G16 = fp['whh'].shape
    H = H4 // 4
    Nt, N_pad = _pick_seq_tile(N, T, C, H)
    if N_pad != N:
        x_tm = jnp.pad(x_tm, ((0, 0), (0, N_pad - N), (0, 0)))
    grid = (N_pad // Nt,)

    kern = functools.partial(_mulcat_block_kernel, bf16_gates=bf16_gates)
    out = pl.pallas_call(
        kern,
        out_shape=jax.ShapeDtypeStruct((T, N_pad, C), jnp.float32),
        grid_spec=pltpu.PrefetchScalarGridSpec(
            num_scalar_prefetch=0,
            grid=grid,
            in_specs=[
                pl.BlockSpec((T, Nt, C), lambda i: (0, i, 0)),
                pl.BlockSpec(fp['wih'].shape, lambda i: (0, 0)),
                pl.BlockSpec(fp['whh'].shape, lambda i: (0, 0)),
                pl.BlockSpec(fp['b'].shape, lambda i: (0, 0)),
                pl.BlockSpec(fp['proj_wt'].shape, lambda i: (0, 0)),
                pl.BlockSpec(fp['proj_b'].shape, lambda i: (0, 0)),
                pl.BlockSpec(fp['blk_wt'].shape, lambda i: (0, 0)),
                pl.BlockSpec(fp['blk_b'].shape, lambda i: (0, 0)),
            ],
            out_specs=pl.BlockSpec((T, Nt, C), lambda i: (0, i, 0)),
            scratch_shapes=[
                pltpu.VMEM((T, Nt, G16), jnp.float32),   # time-major gate pre-activations
                pltpu.VMEM((T, Nt, H4), jnp.bfloat16),   # time-major hidden history [fwd|bwd]
            ],
        ),
        compiler_params=pltpu.CompilerParams(
            dimension_semantics=("parallel",),
            vmem_limit_bytes=_vmem_limit_bytes()),
        cost_estimate=_mulcat_cost(N_pad, T, C, H, fp),
    )(x_tm, fp['wih'], fp['whh'], fp['b'], fp['proj_wt'], fp['proj_b'],
      fp['blk_wt'], fp['blk_b'])
    if N_pad != N:
        out = out[:, :N, :]
    return out


# ----------------------------- fused PReLU + 1x1-conv head -----------------------------

def _head_kernel(x_ref, a_ref, wt_ref, b_ref, o_ref):
    x = x_ref[...]
    xp = jnp.where(x > 0, x, x * a_ref[...])          # PReLU, single shared slope
    o_ref[...] = (jnp.dot(xp.astype(jnp.bfloat16), wt_ref[...],
                          preferred_element_type=jnp.float32) + b_ref[...])


def _prelu_conv_head(x2d, a, wt, b):
    M, C = x2d.shape
    O = wt.shape[1]
    Mt = min(1024, _round_up(M, 8))
    M_pad = _round_up(M, Mt)
    if M_pad != M:
        x2d = jnp.pad(x2d, ((0, M_pad - M), (0, 0)))
    cost = pl.CostEstimate(flops=int(2 * M_pad * C * O + 2 * M_pad * C),
                           transcendentals=0,
                           bytes_accessed=int(M_pad * (C + O) * 4 + _nbytes(wt) + _nbytes(b)))
    y = pl.pallas_call(
        _head_kernel,
        out_shape=jax.ShapeDtypeStruct((M_pad, O), jnp.float32),
        grid_spec=pltpu.PrefetchScalarGridSpec(
            num_scalar_prefetch=0,
            grid=(M_pad // Mt,),
            in_specs=[
                pl.BlockSpec((Mt, C), lambda i: (i, 0)),
                pl.BlockSpec((1, 1), lambda i: (0, 0)),
                pl.BlockSpec(wt.shape, lambda i: (0, 0)),
                pl.BlockSpec(b.shape, lambda i: (0, 0)),
            ],
            out_specs=pl.BlockSpec((Mt, O), lambda i: (i, 0)),
        ),
        compiler_params=pltpu.CompilerParams(
            dimension_semantics=("parallel",),
            vmem_limit_bytes=_vmem_limit_bytes()),
        cost_estimate=cost,
    )(x2d, a, wt, b)
    return y[:M] if M_pad != M else y


# ----------------------------- model glue -----------------------------

def dpmulcat_forward(x, params, num_layers, bf16_gates=False):
    """DPMulCat forward (eval mode, input_normalize=False, bidirectional=True).

    x: (B, C, d1, d2) f32 -> list with one array (B, output_size*num_spk, d1, d2).
    """
    B, C, d1, d2 = x.shape
    # time-major working layouts keep C on lanes and positions in (t, n) row order inside the kernel
    #   rows layout (d1, B, d2, C): rows pass = free reshape to (d1, B*d2, C)
    #   cols layout (d2, B, d1, C): cols pass = free reshape to (d2, B*d1, C)
    cur = jnp.transpose(x, (2, 0, 3, 1))                        # -> rows layout
    for i in range(num_layers):
        cur = _mulcat_block(cur.reshape(d1, B * d2, C),
                            params['rows'][i], bf16_gates).reshape(d1, B, d2, C)
        cur = jnp.transpose(cur, (2, 1, 0, 3))                  # -> cols layout
        cur = _mulcat_block(cur.reshape(d2, B * d1, C),
                            params['cols'][i], bf16_gates).reshape(d2, B, d1, C)
        if i != num_layers - 1:
            cur = jnp.transpose(cur, (2, 1, 0, 3))              # -> rows layout for next layer
    # output head (eval mode: only the final layer's output is returned)
    O = params['conv_wt'].shape[1]
    y = _prelu_conv_head(cur.reshape(d2 * B * d1, C),
                         params['prelu_a'], params['conv_wt'], params['conv_b'])
    y = y.reshape(d2, B, d1, O)
    return [jnp.transpose(y, (1, 3, 2, 0))]                     # (B, O, d1, d2)


# ----------------------------- deterministic parameter init (PyTorch layout) -----------------------------

def _uniform(key, shape, scale):
    return jax.random.uniform(key, shape, jnp.float32, -scale, scale)


def _init_lstm_dir(key, D, H):
    k0, k1, k2, k3 = jax.random.split(key, 4)
    s = 1.0 / math.sqrt(H)
    return dict(
        wih_t=_uniform(k0, (D, 4 * H), s),   # weight_ih^T, gate order i,f,g,o
        whh_t=_uniform(k1, (H, 4 * H), s),   # weight_hh^T
        b=_uniform(k2, (1, 4 * H), s) + _uniform(k3, (1, 4 * H), s),  # bias_ih + bias_hh
    )


def _init_linear(key, din, dout):
    k0, k1 = jax.random.split(key)
    s = 1.0 / math.sqrt(din)
    return dict(wt=_uniform(k0, (din, dout), s), b=_uniform(k1, (1, dout), s))


def _init_mulcat_block(key, D, H):
    ks = jax.random.split(key, 7)
    return dict(
        rnn_f=_init_lstm_dir(ks[0], D, H), rnn_b=_init_lstm_dir(ks[1], D, H),
        rnn_proj=_init_linear(ks[2], 2 * H, D),
        gate_f=_init_lstm_dir(ks[3], D, H), gate_b=_init_lstm_dir(ks[4], D, H),
        gate_proj=_init_linear(ks[5], 2 * H, D),
        block_proj=_init_linear(ks[6], 2 * D, D),
    )


def init_dpmulcat(key, D, H, output_size, num_spk, num_layers):
    keys = jax.random.split(key, 2 * num_layers + 1)
    rows = [_init_mulcat_block(keys[2 * i], D, H) for i in range(num_layers)]
    cols = [_init_mulcat_block(keys[2 * i + 1], D, H) for i in range(num_layers)]
    conv = _init_linear(keys[-1], D, output_size * num_spk)  # 1x1 Conv2d == channel matmul
    prelu_a = jnp.full((1, 1), 0.25, jnp.float32)            # nn.PReLU() default slope
    return dict(rows=rows, cols=cols, conv=conv, prelu_a=prelu_a)


# ----------------------------- weight fusion for the kernels -----------------------------

def _pack_gate_major(mats, H):
    """mats: [rnn_f, gate_f, rnn_b, gate_b], each (..., 4H) with per-source gate order
    [i|f|g|o].  Returns (..., 16H) in the combined gate-major layout
    [i: rnn_f,gate_f,rnn_b,gate_b | f: ... | g: ... | o: ...] (each sub-block H wide)."""
    lead = mats[0].shape[:-1]
    split = [m.reshape(lead + (4, H)) for m in mats]      # (..., gate, h)
    packed = jnp.stack(split, axis=-2)                    # (..., gate, src, h)
    return packed.reshape(lead + (16 * H,))


def _fuse_block_params(bp, H, C):
    bf16 = jnp.bfloat16
    srcs = [bp['rnn_f'], bp['gate_f'], bp['rnn_b'], bp['gate_b']]

    wih = _pack_gate_major([s['wih_t'] for s in srcs], H)            # (C, 16H)
    b = _pack_gate_major([s['b'] for s in srcs], H)                  # (1, 16H)

    # recurrent weight rows follow the fused hidden layout [rnn_f | gate_f | rnn_b | gate_b]
    z = jnp.zeros((H, 4 * H), jnp.float32)
    whh_rows = []
    for src_idx, s in enumerate(srcs):
        mats = [z, z, z, z]
        mats[src_idx] = s['whh_t']
        whh_rows.append(_pack_gate_major(mats, H))                   # (H, 16H)
    whh = jnp.concatenate(whh_rows, axis=0)                          # (4H, 16H) block-diagonal

    rp, gp = bp['rnn_proj'], bp['gate_proj']
    zc = jnp.zeros((H, C), jnp.float32)
    # rows: [h_rnn_f | h_gate_f | h_rnn_b | h_gate_b]; cols: [rnn_proj out | gate_proj out]
    proj_wt = jnp.concatenate([
        jnp.concatenate([rp['wt'][:H], zc], axis=1),
        jnp.concatenate([zc, gp['wt'][:H]], axis=1),
        jnp.concatenate([rp['wt'][H:], zc], axis=1),
        jnp.concatenate([zc, gp['wt'][H:]], axis=1),
    ], axis=0)                                                       # (4H, 2C)

    blk = bp['block_proj']
    return dict(
        wih=wih.astype(bf16),                                        # (C, 16H)
        whh=whh.astype(bf16),                                        # (4H, 16H)
        b=b,                                                         # (1, 16H) f32
        proj_wt=proj_wt.astype(bf16),                                # (4H, 2C)
        proj_b=jnp.concatenate([rp['b'], gp['b']], axis=1),          # (1, 2C) f32
        blk_wt=blk['wt'].astype(bf16),                               # (2C, C): rows [gated | input]
        blk_b=blk['b'],                                              # (1, C) f32
    )


def prepare_params(raw, H, C):
    return dict(
        rows=[_fuse_block_params(p, H, C) for p in raw['rows']],
        cols=[_fuse_block_params(p, H, C) for p in raw['cols']],
        conv_wt=raw['conv']['wt'].astype(jnp.bfloat16),
        conv_b=raw['conv']['b'],
        prelu_a=raw['prelu_a'],
    )


# ----------------------------- main -----------------------------

if __name__ == "__main__":
    B, C, d1, d2 = 2, 16, 8, 8          # batch, input_size, rows, cols
    H = 16                              # hidden_size (16H = 256 fused gate lanes)
    output_size, num_spk, num_layers = 16, 2, 1

    key = jax.random.PRNGKey(0)
    kx, kp = jax.random.split(key)
    x = jax.random.normal(kx, (B, C, d1, d2), jnp.float32)
    raw = init_dpmulcat(kp, C, H, output_size, num_spk, num_layers)
    params = prepare_params(raw, H, C)
    bf16_gates = _use_bf16_gates()

    fwd = jax.jit(lambda xx, pp: dpmulcat_forward(xx, pp, num_layers, bf16_gates))
    outs = fwd(x, params)
    y = jax.block_until_ready(outs[-1])
    assert y.shape == (B, output_size * num_spk, d1, d2), y.shape
    assert bool(jnp.all(jnp.isfinite(y)))
    print("KERNEL_OK")
</pallas_src>

<mosaic_0001>
module attributes {stable_mosaic.version = 11 : i64} {
  func.func @_mulcat_block_kernel(%arg0: i32, %arg1: memref<8x8x16xf32, #tpu.memory_space<vmem>>, %arg2: memref<16x256xbf16, #tpu.memory_space<vmem>>, %arg3: memref<64x256xbf16, #tpu.memory_space<vmem>>, %arg4: memref<1x256xf32, #tpu.memory_space<vmem>>, %arg5: memref<64x32xbf16, #tpu.memory_space<vmem>>, %arg6: memref<1x32xf32, #tpu.memory_space<vmem>>, %arg7: memref<32x16xbf16, #tpu.memory_space<vmem>>, %arg8: memref<1x16xf32, #tpu.memory_space<vmem>>, %arg9: memref<8x8x16xf32, #tpu.memory_space<vmem>>, %arg10: memref<8x8x256xf32, #tpu.memory_space<vmem>>, %arg11: memref<8x8x64xbf16, #tpu.memory_space<vmem>>) attributes {dimension_semantics = [#tpu.dimension_semantics<parallel>], iteration_bounds = array<i64: 2>, scalar_prefetch = 0 : i64, scratch_operands = 2 : i64, tpu.core_type = #tpu.core_type<tc>, window_params = [{transform_indices = @transform_0, window_bounds = array<i64: 8, 8, 16>}, {pipeline_mode = #tpu.pipeline_mode<synchronous>, transform_indices = @transform_1, window_bounds = array<i64: 16, 256>}, {pipeline_mode = #tpu.pipeline_mode<synchronous>, transform_indices = @transform_2, window_bounds = array<i64: 64, 256>}, {pipeline_mode = #tpu.pipeline_mode<synchronous>, transform_indices = @transform_3, window_bounds = array<i64: 1, 256>}, {pipeline_mode = #tpu.pipeline_mode<synchronous>, transform_indices = @transform_4, window_bounds = array<i64: 64, 32>}, {pipeline_mode = #tpu.pipeline_mode<synchronous>, transform_indices = @transform_5, window_bounds = array<i64: 1, 32>}, {pipeline_mode = #tpu.pipeline_mode<synchronous>, transform_indices = @transform_6, window_bounds = array<i64: 32, 16>}, {pipeline_mode = #tpu.pipeline_mode<synchronous>, transform_indices = @transform_7, window_bounds = array<i64: 1, 16>}, {transform_indices = @transform_8, window_bounds = array<i64: 8, 8, 16>}]} {
    %c0 = arith.constant 0 : index
    %c0_0 = arith.constant 0 : index
    %c0_1 = arith.constant 0 : index
    %0 = vector.load %arg1[%c0, %c0_0, %c0_1] : memref<8x8x16xf32, #tpu.memory_space<vmem>>, vector<8x8x16xf32>
    %1 = vector.shape_cast %0 : vector<8x8x16xf32> to vector<64x16xf32>
    %2 = arith.truncf %1 : vector<64x16xf32> to vector<64x16xbf16>
    %c0_2 = arith.constant 0 : index
    %c0_3 = arith.constant 0 : index
    %3 = vector.load %arg2[%c0_2, %c0_3] : memref<16x256xbf16, #tpu.memory_space<vmem>>, vector<16x256xbf16>
    %cst = arith.constant dense<0.000000e+00> : vector<64x256xf32>
    %4 = tpu.matmul %2, %3, %cst {dimension_numbers = #tpu.dot_dimension_numbers<[1], [0], [0], [1], [0, 0, 1, 1], [], []>} : vector<64x16xbf16>, vector<16x256xbf16>, vector<64x256xf32> -> vector<64x256xf32>
    %c0_4 = arith.constant 0 : index
    %c0_5 = arith.constant 0 : index
    %5 = vector.load %arg4[%c0_4, %c0_5] : memref<1x256xf32, #tpu.memory_space<vmem>>, vector<1x256xf32>
    %6 = vector.broadcast %5 : vector<1x256xf32> to vector<64x256xf32>
    %7 = arith.addf %4, %6 : vector<64x256xf32>
    %8 = vector.shape_cast %7 : vector<64x256xf32> to vector<8x8x256xf32>
    %c0_6 = arith.constant 0 : index
    %c0_7 = arith.constant 0 : index
    %c0_8 = arith.constant 0 : index
    %9 = vector.load %arg10[%c0_6, %c0_7, %c0_8] : memref<8x8x256xf32, #tpu.memory_space<vmem>>, vector<8x8x256xf32>
    tpu.vector_store %arg10[%c0_6, %c0_7, %c0_8], %8 {strides = array<i32>} : memref<8x8x256xf32, #tpu.memory_space<vmem>>, vector<8x8x256xf32>,
    %c0_9 = arith.constant 0 : index
    %c0_10 = arith.constant 0 : index
    %10 = vector.load %arg3[%c0_9, %c0_10] : memref<64x256xbf16, #tpu.memory_space<vmem>>, vector<64x256xbf16>
    %11 = tpu.iota {dimensions = array<i32: 1>} : vector<1x256xi32>
    %c64_i32 = arith.constant 64 : i32
    %c0_i32 = arith.constant 0 : i32
    %12 = arith.cmpi eq, %c64_i32, %c0_i32 : i32
    %c1_i32 = arith.constant 1 : i32
    %13 = arith.select %12, %c1_i32, %c64_i32 : i32
    %14 = vector.broadcast %13 : i32 to vector<1x256xi32>
    %15 = arith.remsi %11, %14 : vector<1x256xi32>
    %c0_i32_11 = arith.constant 0 : i32
    %16 = vector.broadcast %c0_i32_11 : i32 to vector<1x256xi32>
    %17 = arith.cmpi ne, %15, %16 : vector<1x256xi32>
    %c0_i32_12 = arith.constant 0 : i32
    %18 = vector.broadcast %c0_i32_12 : i32 to vector<1x256xi32>
    %19 = arith.cmpi slt, %15, %18 : vector<1x256xi32>
    %c0_i32_13 = arith.constant 0 : i32
    %20 = arith.cmpi slt, %13, %c0_i32_13 : i32
    %21 = vector.broadcast %20 : i1 to vector<1x256xi1>
    %22 = vector.broadcast %21 : vector<1x256xi1> to vector<1x256xi1>
    %23 = arith.xori %19, %22 : vector<1x256xi1>
    %24 = arith.andi %23, %17 : vector<1x256xi1>
    %25 = vector.broadcast %13 : i32 to vector<1x256xi32>
    %26 = arith.addi %15, %25 : vector<1x256xi32>
    %27 = arith.select %24, %26, %15 : vector<1x256xi1>, vector<1x256xi32>
    %c32_i32 = arith.constant 32 : i32
    %28 = vector.broadcast %c32_i32 : i32 to vector<1x256xi32>
    %29 = arith.cmpi slt, %27, %28 : vector<1x256xi32>
    %cst_14 = arith.constant 0.000000e+00 : bf16
    %30 = vector.broadcast %cst_14 : bf16 to vector<8x64xbf16>
    %cst_15 = arith.constant 0.000000e+00 : f32
    %31 = vector.broadcast %cst_15 : f32 to vector<8x64xf32>
    %c0_i32_16 = arith.constant 0 : i32
    %c7_i32 = arith.constant 7 : i32
    %32 = arith.subi %c7_i32, %c0_i32_16 : i32
    %cst_17 = arith.constant dense<0.000000e+00> : vector<8x256xf32>
    %33 = tpu.matmul %30, %10, %cst_17 {dimension_numbers = #tpu.dot_dimension_numbers<[1], [0], [0], [1], [0, 0, 1, 1], [], []>} : vector<8x64xbf16>, vector<64x256xbf16>, vector<8x256xf32> -> vector<8x256xf32>
    %34 = arith.index_cast %c0_i32_16 : i32 to index
    %c0_18 = arith.constant 0 : index
    %c0_19 = arith.constant 0 : index
    %35 = vector.load %arg10[%34, %c0_18, %c0_19] : memref<8x8x256xf32, #tpu.memory_space<vmem>>, vector<1x8x256xf32>
    %36 = vector.shape_cast %35 : vector<1x8x256xf32> to vector<8x256xf32>
    %37 = arith.index_cast %32 : i32 to index
    %c0_20 = arith.constant 0 : index
    %c0_21 = arith.constant 0 : index
    %38 = vector.load %arg10[%37, %c0_20, %c0_21] : memref<8x8x256xf32, #tpu.memory_space<vmem>>, vector<1x8x256xf32>
    %39 = vector.shape_cast %38 : vector<1x8x256xf32> to vector<8x256xf32>
    %40 = vector.shape_cast %29 : vector<1x256xi1> to vector<1x256xi1>
    %41 = vector.broadcast %40 : vector<1x256xi1> to vector<8x256xi1>
    %42 = arith.select %41, %36, %39 : vector<8x256xi1>, vector<8x256xf32>
    %43 = arith.addf %33, %42 : vector<8x256xf32>
    %44 = vector.extract_strided_slice %43 {offsets = [0, 0], sizes = [8, 64], strides = [1, 1]} : vector<8x256xf32> to vector<8x64xf32>
    %45 = arith.negf %44 : vector<8x64xf32>
    %46 = math.exp %45 : vector<8x64xf32>
    %cst_22 = arith.constant 1.000000e+00 : f32
    %47 = vector.broadcast %cst_22 : f32 to vector<8x64xf32>
    %48 = arith.addf %47, %46 : vector<8x64xf32>
    %49 = arith.divf %47, %48 : vector<8x64xf32>
    %50 = vector.extract_strided_slice %43 {offsets = [0, 64], sizes = [8, 64], strides = [1, 1]} : vector<8x256xf32> to vector<8x64xf32>
    %51 = arith.negf %50 : vector<8x64xf32>
    %52 = math.exp %51 : vector<8x64xf32>
    %cst_23 = arith.constant 1.000000e+00 : f32
    %53 = vector.broadcast %cst_23 : f32 to vector<8x64xf32>
    %54 = arith.addf %53, %52 : vector<8x64xf32>
    %55 = arith.divf %53, %54 : vector<8x64xf32>
    %56 = vector.extract_strided_slice %43 {offsets = [0, 128], sizes = [8, 64], strides = [1, 1]} : vector<8x256xf32> to vector<8x64xf32>
    %57 = math.tanh %56 : vector<8x64xf32>
    %58 = vector.extract_strided_slice %43 {offsets = [0, 192], sizes = [8, 64], strides = [1, 1]} : vector<8x256xf32> to vector<8x64xf32>
    %59 = arith.negf %58 : vector<8x64xf32>
    %60 = math.exp %59 : vector<8x64xf32>
    %cst_24 = arith.constant 1.000000e+00 : f32
    %61 = vector.broadcast %cst_24 : f32 to vector<8x64xf32>
    %62 = arith.addf %61, %60 : vector<8x64xf32>
    %63 = arith.divf %61, %62 : vector<8x64xf32>
    %64 = arith.mulf %55, %31 : vector<8x64xf32>
    %65 = arith.mulf %49, %57 : vector<8x64xf32>
    %66 = arith.addf %64, %65 : vector<8x64xf32>
    %67 = math.tanh %66 : vector<8x64xf32>
    %68 = arith.mulf %63, %67 : vector<8x64xf32>
    %69 = arith.truncf %68 : vector<8x64xf32> to vector<8x64xbf16>
    %70 = vector.extract_strided_slice %69 {offsets = [0, 0], sizes = [8, 32], strides = [1, 1]} : vector<8x64xbf16> to vector<8x32xbf16>
    %71 = arith.index_cast %c0_i32_16 : i32 to index
    %c0_25 = arith.constant 0 : index
    %c0_26 = arith.constant 0 : index
    %72 = vector.load %arg11[%71, %c0_25, %c0_26] : memref<8x8x64xbf16, #tpu.memory_space<vmem>>, vector<1x8x32xbf16>
    %73 = vector.shape_cast %72 : vector<1x8x32xbf16> to vector<8x32xbf16>
    %74 = vector.shape_cast %70 : vector<8x32xbf16> to vector<1x8x32xbf16>
    tpu.vector_store %arg11[%71, %c0_25, %c0_26], %74 {strides = array<i32>} : memref<8x8x64xbf16, #tpu.memory_space<vmem>>, vector<1x8x32xbf16>,
    %75 = vector.extract_strided_slice %69 {offsets = [0, 32], sizes = [8, 32], strides = [1, 1]} : vector<8x64xbf16> to vector<8x32xbf16>
    %76 = arith.index_cast %32 : i32 to index
    %c0_27 = arith.constant 0 : index
    %c32 = arith.constant 32 : index
    %77 = vector.load %arg11[%76, %c0_27, %c32] : memref<8x8x64xbf16, #tpu.memory_space<vmem>>, vector<1x8x32xbf16>
    %78 = vector.shape_cast %77 : vector<1x8x32xbf16> to vector<8x32xbf16>
    %79 = vector.shape_cast %75 : vector<8x32xbf16> to vector<1x8x32xbf16>
    tpu.vector_store %arg11[%76, %c0_27, %c32], %79 {strides = array<i32>} : memref<8x8x64xbf16, #tpu.memory_space<vmem>>, vector<1x8x32xbf16>,
    %c1_i32_28 = arith.constant 1 : i32
    %c7_i32_29 = arith.constant 7 : i32
    %80 = arith.subi %c7_i32_29, %c1_i32_28 : i32
    %cst_30 = arith.constant dense<0.000000e+00> : vector<8x256xf32>
    %81 = tpu.matmul %69, %10, %cst_30 {dimension_numbers = #tpu.dot_dimension_numbers<[1], [0], [0], [1], [0, 0, 1, 1], [], []>} : vector<8x64xbf16>, vector<64x256xbf16>, vector<8x256xf32> -> vector<8x256xf32>
    %82 = arith.index_cast %c1_i32_28 : i32 to index
    %c0_31 = arith.constant 0 : index
    %c0_32 = arith.constant 0 : index
    %83 = vector.load %arg10[%82, %c0_31, %c0_32] : memref<8x8x256xf32, #tpu.memory_space<vmem>>, vector<1x8x256xf32>
    %84 = vector.shape_cast %83 : vector<1x8x256xf32> to vector<8x256xf32>
    %85 = arith.index_cast %80 : i32 to index
    %c0_33 = arith.constant 0 : index
    %c0_34 = arith.constant 0 : index
    %86 = vector.load %arg10[%85, %c0_33, %c0_34] : memref<8x8x256xf32, #tpu.memory_space<vmem>>, vector<1x8x256xf32>
    %87 = vector.shape_cast %86 : vector<1x8x256xf32> to vector<8x256xf32>
    %88 = vector.shape_cast %29 : vector<1x256xi1> to vector<1x256xi1>
    %89 = vector.broadcast %88 : vector<1x256xi1> to vector<8x256xi1>
    %90 = arith.select %89, %84, %87 : vector<8x256xi1>, vector<8x256xf32>
    %91 = arith.addf %81, %90 : vector<8x256xf32>
    %92 = vector.extract_strided_slice %91 {offsets = [0, 0], sizes = [8, 64], strides = [1, 1]} : vector<8x256xf32> to vector<8x64xf32>
    %93 = arith.negf %92 : vector<8x64xf32>
    %94 = math.exp %93 : vector<8x64xf32>
    %cst_35 = arith.constant 1.000000e+00 : f32
    %95 = vector.broadcast %cst_35 : f32 to vector<8x64xf32>
    %96 = arith.addf %95, %94 : vector<8x64xf32>
    %97 = arith.divf %95, %96 : vector<8x64xf32>
    %98 = vector.extract_strided_slice %91 {offsets = [0, 64], sizes = [8, 64], strides = [1, 1]} : vector<8x256xf32> to vector<8x64xf32>
    %99 = arith.negf %98 : vector<8x64xf32>
    %100 = math.exp %99 : vector<8x64xf32>
    %cst_36 = arith.constant 1.000000e+00 : f32
    %101 = vector.broadcast %cst_36 : f32 to vector<8x64xf32>
    %102 = arith.addf %101, %100 : vector<8x64xf32>
    %103 = arith.divf %101, %102 : vector<8x64xf32>
    %104 = vector.extract_strided_slice %91 {offsets = [0, 128], sizes = [8, 64], strides = [1, 1]} : vector<8x256xf32> to vector<8x64xf32>
    %105 = math.tanh %104 : vector<8x64xf32>
    %106 = vector.extract_strided_slice %91 {offsets = [0, 192], sizes = [8, 64], strides = [1, 1]} : vector<8x256xf32> to vector<8x64xf32>
    %107 = arith.negf %106 : vector<8x64xf32>
    %108 = math.exp %107 : vector<8x64xf32>
    %cst_37 = arith.constant 1.000000e+00 : f32
    %109 = vector.broadcast %cst_37 : f32 to vector<8x64xf32>
    %110 = arith.addf %109, %108 : vector<8x64xf32>
    %111 = arith.divf %109, %110 : vector<8x64xf32>
    %112 = arith.mulf %103, %66 : vector<8x64xf32>
    %113 = arith.mulf %97, %105 : vector<8x64xf32>
    %114 = arith.addf %112, %113 : vector<8x64xf32>
    %115 = math.tanh %114 : vector<8x64xf32>
    %116 = arith.mulf %111, %115 : vector<8x64xf32>
    %117 = arith.truncf %116 : vector<8x64xf32> to vector<8x64xbf16>
    %118 = vector.extract_strided_slice %117 {offsets = [0, 0], sizes = [8, 32], strides = [1, 1]} : vector<8x64xbf16> to vector<8x32xbf16>
    %119 = arith.index_cast %c1_i32_28 : i32 to index
    %c0_38 = arith.constant 0 : index
    %c0_39 = arith.constant 0 : index
    %120 = vector.load %arg11[%119, %c0_38, %c0_39] : memref<8x8x64xbf16, #tpu.memory_space<vmem>>, vector<1x8x32xbf16>
    %121 = vector.shape_cast %120 : vector<1x8x32xbf16> to vector<8x32xbf16>
    %122 = vector.shape_cast %118 : vector<8x32xbf16> to vector<1x8x32xbf16>
    tpu.vector_store %arg11[%119, %c0_38, %c0_39], %122 {strides = array<i32>} : memref<8x8x64xbf16, #tpu.memory_space<vmem>>, vector<1x8x32xbf16>,
    %123 = vector.extract_strided_slice %117 {offsets = [0, 32], sizes = [8, 32], strides = [1, 1]} : vector<8x64xbf16> to vector<8x32xbf16>
    %124 = arith.index_cast %80 : i32 to index
    %c0_40 = arith.constant 0 : index
    %c32_41 = arith.constant 32 : index
    %125 = vector.load %arg11[%124, %c0_40, %c32_41] : memref<8x8x64xbf16, #tpu.memory_space<vmem>>, vector<1x8x32xbf16>
    %126 = vector.shape_cast %125 : vector<1x8x32xbf16> to vector<8x32xbf16>
    %127 = vector.shape_cast %123 : vector<8x32xbf16> to vector<1x8x32xbf16>
    tpu.vector_store %arg11[%124, %c0_40, %c32_41], %127 {strides = array<i32>} : memref<8x8x64xbf16, #tpu.memory_space<vmem>>, vector<1x8x32xbf16>,
    %c2_i32 = arith.constant 2 : i32
    %c7_i32_42 = arith.constant 7 : i32
    %128 = arith.subi %c7_i32_42, %c2_i32 : i32
    %cst_43 = arith.constant dense<0.000000e+00> : vector<8x256xf32>
    %129 = tpu.matmul %117, %10, %cst_43 {dimension_numbers = #tpu.dot_dimension_numbers<[1], [0], [0], [1], [0, 0, 1, 1], [], []>} : vector<8x64xbf16>, vector<64x256xbf16>, vector<8x256xf32> -> vector<8x256xf32>
    %130 = arith.index_cast %c2_i32 : i32 to index
    %c0_44 = arith.constant 0 : index
    %c0_45 = arith.constant 0 : index
    %131 = vector.load %arg10[%130, %c0_44, %c0_45] : memref<8x8x256xf32, #tpu.memory_space<vmem>>, vector<1x8x256xf32>
    %132 = vector.shape_cast %131 : vector<1x8x256xf32> to vector<8x256xf32>
    %133 = arith.index_cast %128 : i32 to index
    %c0_46 = arith.constant 0 : index
    %c0_47 = arith.constant 0 : index
    %134 = vector.load %arg10[%133, %c0_46, %c0_47] : memref<8x8x256xf32, #tpu.memory_space<vmem>>, vector<1x8x256xf32>
    %135 = vector.shape_cast %134 : vector<1x8x256xf32> to vector<8x256xf32>
    %136 = vector.shape_cast %29 : vector<1x256xi1> to vector<1x256xi1>
    %137 = vector.broadcast %136 : vector<1x256xi1> to vector<8x256xi1>
    %138 = arith.select %137, %132, %135 : vector<8x256xi1>, vector<8x256xf32>
    %139 = arith.addf %129, %138 : vector<8x256xf32>
    %140 = vector.extract_strided_slice %139 {offsets = [0, 0], sizes = [8, 64], strides = [1, 1]} : vector<8x256xf32> to vector<8x64xf32>
    %141 = arith.negf %140 : vector<8x64xf32>
    %142 = math.exp %141 : vector<8x64xf32>
    %cst_48 = arith.constant 1.000000e+00 : f32
    %143 = vector.broadcast %cst_48 : f32 to vector<8x64xf32>
    %144 = arith.addf %143, %142 : vector<8x64xf32>
    %145 = arith.divf %143, %144 : vector<8x64xf32>
    %146 = vector.extract_strided_slice %139 {offsets = [0, 64], sizes = [8, 64], strides = [1, 1]} : vector<8x256xf32> to vector<8x64xf32>
    %147 = arith.negf %146 : vector<8x64xf32>
    %148 = math.exp %147 : vector<8x64xf32>
    %cst_49 = arith.constant 1.000000e+00 : f32
    %149 = vector.broadcast %cst_49 : f32 to vector<8x64xf32>
    %150 = arith.addf %149, %148 : vector<8x64xf32>
    %151 = arith.divf %149, %150 : vector<8x64xf32>
    %152 = vector.extract_strided_slice %139 {offsets = [0, 128], sizes = [8, 64], strides = [1, 1]} : vector<8x256xf32> to vector<8x64xf32>
    %153 = math.tanh %152 : vector<8x64xf32>
    %154 = vector.extract_strided_slice %139 {offsets = [0, 192], sizes = [8, 64], strides = [1, 1]} : vector<8x256xf32> to vector<8x64xf32>
    %155 = arith.negf %154 : vector<8x64xf32>
    %156 = math.exp %155 : vector<8x64xf32>
    %cst_50 = arith.constant 1.000000e+00 : f32
    %157 = vector.broadcast %cst_50 : f32 to vector<8x64xf32>
    %158 = arith.addf %157, %156 : vector<8x64xf32>
    %159 = arith.divf %157, %158 : vector<8x64xf32>
    %160 = arith.mulf %151, %114 : vector<8x64xf32>
    %161 = arith.mulf %145, %153 : vector<8x64xf32>
    %162 = arith.addf %160, %161 : vector<8x64xf32>
    %163 = math.tanh %162 : vector<8x64xf32>
    %164 = arith.mulf %159, %163 : vector<8x64xf32>
    %165 = arith.truncf %164 : vector<8x64xf32> to vector<8x64xbf16>
    %166 = vector.extract_strided_slice %165 {offsets = [0, 0], sizes = [8, 32], strides = [1, 1]} : vector<8x64xbf16> to vector<8x32xbf16>
    %167 = arith.index_cast %c2_i32 : i32 to index
    %c0_51 = arith.constant 0 : index
    %c0_52 = arith.constant 0 : index
    %168 = vector.load %arg11[%167, %c0_51, %c0_52] : memref<8x8x64xbf16, #tpu.memory_space<vmem>>, vector<1x8x32xbf16>
    %169 = vector.shape_cast %168 : vector<1x8x32xbf16> to vector<8x32xbf16>
    %170 = vector.shape_cast %166 : vector<8x32xbf16> to vector<1x8x32xbf16>
    tpu.vector_store %arg11[%167, %c0_51, %c0_52], %170 {strides = array<i32>} : memref<8x8x64xbf16, #tpu.memory_space<vmem>>, vector<1x8x32xbf16>,
    %171 = vector.extract_strided_slice %165 {offsets = [0, 32], sizes = [8, 32], strides = [1, 1]} : vector<8x64xbf16> to vector<8x32xbf16>
    %172 = arith.index_cast %128 : i32 to index
    %c0_53 = arith.constant 0 : index
    %c32_54 = arith.constant 32 : index
    %173 = vector.load %arg11[%172, %c0_53, %c32_54] : memref<8x8x64xbf16, #tpu.memory_space<vmem>>, vector<1x8x32xbf16>
    %174 = vector.shape_cast %173 : vector<1x8x32xbf16> to vector<8x32xbf16>
    %175 = vector.shape_cast %171 : vector<8x32xbf16> to vector<1x8x32xbf16>
    tpu.vector_store %arg11[%172, %c0_53, %c32_54], %175 {strides = array<i32>} : memref<8x8x64xbf16, #tpu.memory_space<vmem>>, vector<1x8x32xbf16>,
    %c3_i32 = arith.constant 3 : i32
    %c7_i32_55 = arith.constant 7 : i32
    %176 = arith.subi %c7_i32_55, %c3_i32 : i32
    %cst_56 = arith.constant dense<0.000000e+00> : vector<8x256xf32>
    %177 = tpu.matmul %165, %10, %cst_56 {dimension_numbers = #tpu.dot_dimension_numbers<[1], [0], [0], [1], [0, 0, 1, 1], [], []>} : vector<8x64xbf16>, vector<64x256xbf16>, vector<8x256xf32> -> vector<8x256xf32>
    %178 = arith.index_cast %c3_i32 : i32 to index
    %c0_57 = arith.constant 0 : index
    %c0_58 = arith.constant 0 : index
    %179 = vector.load %arg10[%178, %c0_57, %c0_58] : memref<8x8x256xf32, #tpu.memory_space<vmem>>, vector<1x8x256xf32>
    %180 = vector.shape_cast %179 : vector<1x8x256xf32> to vector<8x256xf32>
    %181 = arith.index_cast %176 : i32 to index
    %c0_59 = arith.constant 0 : index
    %c0_60 = arith.constant 0 : index
    %182 = vector.load %arg10[%181, %c0_59, %c0_60] : memref<8x8x256xf32, #tpu.memory_space<vmem>>, vector<1x8x256xf32>
    %183 = vector.shape_cast %182 : vector<1x8x256xf32> to vector<8x256xf32>
    %184 = vector.shape_cast %29 : vector<1x256xi1> to vector<1x256xi1>
    %185 = vector.broadcast %184 : vector<1x256xi1> to vector<8x256xi1>
    %186 = arith.select %185, %180, %183 : vector<8x256xi1>, vector<8x256xf32>
    %187 = arith.addf %177, %186 : vector<8x256xf32>
    %188 = vector.extract_strided_slice %187 {offsets = [0, 0], sizes = [8, 64], strides = [1, 1]} : vector<8x256xf32> to vector<8x64xf32>
    %189 = arith.negf %188 : vector<8x64xf32>
    %190 = math.exp %189 : vector<8x64xf32>
    %cst_61 = arith.constant 1.000000e+00 : f32
    %191 = vector.broadcast %cst_61 : f32 to vector<8x64xf32>
    %192 = arith.addf %191, %190 : vector<8x64xf32>
    %193 = arith.divf %191, %192 : vector<8x64xf32>
    %194 = vector.extract_strided_slice %187 {offsets = [0, 64], sizes = [8, 64], strides = [1, 1]} : vector<8x256xf32> to vector<8x64xf32>
    %195 = arith.negf %194 : vector<8x64xf32>
    %196 = math.exp %195 : vector<8x64xf32>
    %cst_62 = arith.constant 1.000000e+00 : f32
    %197 = vector.broadcast %cst_62 : f32 to vector<8x64xf32>
    %198 = arith.addf %197, %196 : vector<8x64xf32>
    %199 = arith.divf %197, %198 : vector<8x64xf32>
    %200 = vector.extract_strided_slice %187 {offsets = [0, 128], sizes = [8, 64], strides = [1, 1]} : vector<8x256xf32> to vector<8x64xf32>
    %201 = math.tanh %200 : vector<8x64xf32>
    %202 = vector.extract_strided_slice %187 {offsets = [0, 192], sizes = [8, 64], strides = [1, 1]} : vector<8x256xf32> to vector<8x64xf32>
    %203 = arith.negf %202 : vector<8x64xf32>
    %204 = math.exp %203 : vector<8x64xf32>
    %cst_63 = arith.constant 1.000000e+00 : f32
    %205 = vector.broadcast %cst_63 : f32 to vector<8x64xf32>
    %206 = arith.addf %205, %204 : vector<8x64xf32>
    %207 = arith.divf %205, %206 : vector<8x64xf32>
    %208 = arith.mulf %199, %162 : vector<8x64xf32>
    %209 = arith.mulf %193, %201 : vector<8x64xf32>
    %210 = arith.addf %208, %209 : vector<8x64xf32>
    %211 = math.tanh %210 : vector<8x64xf32>
    %212 = arith.mulf %207, %211 : vector<8x64xf32>
    %213 = arith.truncf %212 : vector<8x64xf32> to vector<8x64xbf16>
    %214 = vector.extract_strided_slice %213 {offsets = [0, 0], sizes = [8, 32], strides = [1, 1]} : vector<8x64xbf16> to vector<8x32xbf16>
    %215 = arith.index_cast %c3_i32 : i32 to index
    %c0_64 = arith.constant 0 : index
    %c0_65 = arith.constant 0 : index
    %216 = vector.load %arg11[%215, %c0_64, %c0_65] : memref<8x8x64xbf16, #tpu.memory_space<vmem>>, vector<1x8x32xbf16>
    %217 = vector.shape_cast %216 : vector<1x8x32xbf16> to vector<8x32xbf16>
    %218 = vector.shape_cast %214 : vector<8x32xbf16> to vector<1x8x32xbf16>
    tpu.vector_store %arg11[%215, %c0_64, %c0_65], %218 {strides = array<i32>} : memref<8x8x64xbf16, #tpu.memory_space<vmem>>, vector<1x8x32xbf16>,
    %219 = vector.extract_strided_slice %213 {offsets = [0, 32], sizes = [8, 32], strides = [1, 1]} : vector<8x64xbf16> to vector<8x32xbf16>
    %220 = arith.index_cast %176 : i32 to index
    %c0_66 = arith.constant 0 : index
    %c32_67 = arith.constant 32 : index
    %221 = vector.load %arg11[%220, %c0_66, %c32_67] : memref<8x8x64xbf16, #tpu.memory_space<vmem>>, vector<1x8x32xbf16>
    %222 = vector.shape_cast %221 : vector<1x8x32xbf16> to vector<8x32xbf16>
    %223 = vector.shape_cast %219 : vector<8x32xbf16> to vector<1x8x32xbf16>
    tpu.vector_store %arg11[%220, %c0_66, %c32_67], %223 {strides = array<i32>} : memref<8x8x64xbf16, #tpu.memory_space<vmem>>, vector<1x8x32xbf16>,
    %c4_i32 = arith.constant 4 : i32
    %c7_i32_68 = arith.constant 7 : i32
    %224 = arith.subi %c7_i32_68, %c4_i32 : i32
    %cst_69 = arith.constant dense<0.000000e+00> : vector<8x256xf32>
    %225 = tpu.matmul %213, %10, %cst_69 {dimension_numbers = #tpu.dot_dimension_numbers<[1], [0], [0], [1], [0, 0, 1, 1], [], []>} : vector<8x64xbf16>, vector<64x256xbf16>, vector<8x256xf32> -> vector<8x256xf32>
    %226 = arith.index_cast %c4_i32 : i32 to index
    %c0_70 = arith.constant 0 : index
    %c0_71 = arith.constant 0 : index
    %227 = vector.load %arg10[%226, %c0_70, %c0_71] : memref<8x8x256xf32, #tpu.memory_space<vmem>>, vector<1x8x256xf32>
    %228 = vector.shape_cast %227 : vector<1x8x256xf32> to vector<8x256xf32>
    %229 = arith.index_cast %224 : i32 to index
    %c0_72 = arith.constant 0 : index
    %c0_73 = arith.constant 0 : index
    %230 = vector.load %arg10[%229, %c0_72, %c0_73] : memref<8x8x256xf32, #tpu.memory_space<vmem>>, vector<1x8x256xf32>
    %231 = vector.shape_cast %230 : vector<1x8x256xf32> to vector<8x256xf32>
    %232 = vector.shape_cast %29 : vector<1x256xi1> to vector<1x256xi1>
    %233 = vector.broadcast %232 : vector<1x256xi1> to vector<8x256xi1>
    %234 = arith.select %233, %228, %231 : vector<8x256xi1>, vector<8x256xf32>
    %235 = arith.addf %225, %234 : vector<8x256xf32>
    %236 = vector.extract_strided_slice %235 {offsets = [0, 0], sizes = [8, 64], strides = [1, 1]} : vector<8x256xf32> to vector<8x64xf32>
    %237 = arith.negf %236 : vector<8x64xf32>
    %238 = math.exp %237 : vector<8x64xf32>
    %cst_74 = arith.constant 1.000000e+00 : f32
    %239 = vector.broadcast %cst_74 : f32 to vector<8x64xf32>
    %240 = arith.addf %239, %238 : vector<8x64xf32>
    %241 = arith.divf %239, %240 : vector<8x64xf32>
    %242 = vector.extract_strided_slice %235 {offsets = [0, 64], sizes = [8, 64], strides = [1, 1]} : vector<8x256xf32> to vector<8x64xf32>
    %243 = arith.negf %242 : vector<8x64xf32>
    %244 = math.exp %243 : vector<8x64xf32>
    %cst_75 = arith.constant 1.000000e+00 : f32
    %245 = vector.broadcast %cst_75 : f32 to vector<8x64xf32>
    %246 = arith.addf %245, %244 : vector<8x64xf32>
    %247 = arith.divf %245, %246 : vector<8x64xf32>
    %248 = vector.extract_strided_slice %235 {offsets = [0, 128], sizes = [8, 64], strides = [1, 1]} : vector<8x256xf32> to vector<8x64xf32>
    %249 = math.tanh %248 : vector<8x64xf32>
    %250 = vector.extract_strided_slice %235 {offsets = [0, 192], sizes = [8, 64], strides = [1, 1]} : vector<8x256xf32> to vector<8x64xf32>
    %251 = arith.negf %250 : vector<8x64xf32>
    %252 = math.exp %251 : vector<8x64xf32>
    %cst_76 = arith.constant 1.000000e+00 : f32
    %253 = vector.broadcast %cst_76 : f32 to vector<8x64xf32>
    %254 = arith.addf %253, %252 : vector<8x64xf32>
    %255 = arith.divf %253, %254 : vector<8x64xf32>
    %256 = arith.mulf %247, %210 : vector<8x64xf32>
    %257 = arith.mulf %241, %249 : vector<8x64xf32>
    %258 = arith.addf %256, %257 : vector<8x64xf32>
    %259 = math.tanh %258 : vector<8x64xf32>
    %260 = arith.mulf %255, %259 : vector<8x64xf32>
    %261 = arith.truncf %260 : vector<8x64xf32> to vector<8x64xbf16>
    %262 = vector.extract_strided_slice %261 {offsets = [0, 0], sizes = [8, 32], strides = [1, 1]} : vector<8x64xbf16> to vector<8x32xbf16>
    %263 = arith.index_cast %c4_i32 : i32 to index
    %c0_77 = arith.constant 0 : index
    %c0_78 = arith.constant 0 : index
    %264 = vector.load %arg11[%263, %c0_77, %c0_78] : memref<8x8x64xbf16, #tpu.memory_space<vmem>>, vector<1x8x32xbf16>
    %265 = vector.shape_cast %264 : vector<1x8x32xbf16> to vector<8x32xbf16>
    %266 = vector.shape_cast %262 : vector<8x32xbf16> to vector<1x8x32xbf16>
    tpu.vector_store %arg11[%263, %c0_77, %c0_78], %266 {strides = array<i32>} : memref<8x8x64xbf16, #tpu.memory_space<vmem>>, vector<1x8x32xbf16>,
    %267 = vector.extract_strided_slice %261 {offsets = [0, 32], sizes = [8, 32], strides = [1, 1]} : vector<8x64xbf16> to vector<8x32xbf16>
    %268 = arith.index_cast %224 : i32 to index
    %c0_79 = arith.constant 0 : index
    %c32_80 = arith.constant 32 : index
    %269 = vector.load %arg11[%268, %c0_79, %c32_80] : memref<8x8x64xbf16, #tpu.memory_space<vmem>>, vector<1x8x32xbf16>
    %270 = vector.shape_cast %269 : vector<1x8x32xbf16> to vector<8x32xbf16>
    %271 = vector.shape_cast %267 : vector<8x32xbf16> to vector<1x8x32xbf16>
    tpu.vector_store %arg11[%268, %c0_79, %c32_80], %271 {strides = array<i32>} : memref<8x8x64xbf16, #tpu.memory_space<vmem>>, vector<1x8x32xbf16>,
    %c5_i32 = arith.constant 5 : i32
    %c7_i32_81 = arith.constant 7 : i32
    %272 = arith.subi %c7_i32_81, %c5_i32 : i32
    %cst_82 = arith.constant dense<0.000000e+00> : vector<8x256xf32>
    %273 = tpu.matmul %261, %10, %cst_82 {dimension_numbers = #tpu.dot_dimension_numbers<[1], [0], [0], [1], [0, 0, 1, 1], [], []>} : vector<8x64xbf16>, vector<64x256xbf16>, vector<8x256xf32> -> vector<8x256xf32>
    %274 = arith.index_cast %c5_i32 : i32 to index
    %c0_83 = arith.constant 0 : index
    %c0_84 = arith.constant 0 : index
    %275 = vector.load %arg10[%274, %c0_83, %c0_84] : memref<8x8x256xf32, #tpu.memory_space<vmem>>, vector<1x8x256xf32>
    %276 = vector.shape_cast %275 : vector<1x8x256xf32> to vector<8x256xf32>
    %277 = arith.index_cast %272 : i32 to index
    %c0_85 = arith.constant 0 : index
    %c0_86 = arith.constant 0 : index
    %278 = vector.load %arg10[%277, %c0_85, %c0_86] : memref<8x8x256xf32, #tpu.memory_space<vmem>>, vector<1x8x256xf32>
    %279 = vector.shape_cast %278 : vector<1x8x256xf32> to vector<8x256xf32>
    %280 = vector.shape_cast %29 : vector<1x256xi1> to vector<1x256xi1>
    %281 = vector.broadcast %280 : vector<1x256xi1> to vector<8x256xi1>
    %282 = arith.select %281, %276, %279 : vector<8x256xi1>, vector<8x256xf32>
    %283 = arith.addf %273, %282 : vector<8x256xf32>
    %284 = vector.extract_strided_slice %283 {offsets = [0, 0], sizes = [8, 64], strides = [1, 1]} : vector<8x256xf32> to vector<8x64xf32>
    %285 = arith.negf %284 : vector<8x64xf32>
    %286 = math.exp %285 : vector<8x64xf32>
    %cst_87 = arith.constant 1.000000e+00 : f32
    %287 = vector.broadcast %cst_87 : f32 to vector<8x64xf32>
    %288 = arith.addf %287, %286 : vector<8x64xf32>
    %289 = arith.divf %287, %288 : vector<8x64xf32>
    %290 = vector.extract_strided_slice %283 {offsets = [0, 64], sizes = [8, 64], strides = [1, 1]} : vector<8x256xf32> to vector<8x64xf32>
    %291 = arith.negf %290 : vector<8x64xf32>
    %292 = math.exp %291 : vector<8x64xf32>
    %cst_88 = arith.constant 1.000000e+00 : f32
    %293 = vector.broadcast %cst_88 : f32 to vector<8x64xf32>
    %294 = arith.addf %293, %292 : vector<8x64xf32>
    %295 = arith.divf %293, %294 : vector<8x64xf32>
    %296 = vector.extract_strided_slice %283 {offsets = [0, 128], sizes = [8, 64], strides = [1, 1]} : vector<8x256xf32> to vector<8x64xf32>
    %297 = math.tanh %296 : vector<8x64xf32>
    %298 = vector.extract_strided_slice %283 {offsets = [0, 192], sizes = [8, 64], strides = [1, 1]} : vector<8x256xf32> to vector<8x64xf32>
    %299 = arith.negf %298 : vector<8x64xf32>
    %300 = math.exp %299 : vector<8x64xf32>
    %cst_89 = arith.constant 1.000000e+00 : f32
    %301 = vector.broadcast %cst_89 : f32 to vector<8x64xf32>
    %302 = arith.addf %301, %300 : vector<8x64xf32>
    %303 = arith.divf %301, %302 : vector<8x64xf32>
    %304 = arith.mulf %295, %258 : vector<8x64xf32>
    %305 = arith.mulf %289, %297 : vector<8x64xf32>
    %306 = arith.addf %304, %305 : vector<8x64xf32>
    %307 = math.tanh %306 : vector<8x64xf32>
    %308 = arith.mulf %303, %307 : vector<8x64xf32>
    %309 = arith.truncf %308 : vector<8x64xf32> to vector<8x64xbf16>
    %310 = vector.extract_strided_slice %309 {offsets = [0, 0], sizes = [8, 32], strides = [1, 1]} : vector<8x64xbf16> to vector<8x32xbf16>
    %311 = arith.index_cast %c5_i32 : i32 to index
    %c0_90 = arith.constant 0 : index
    %c0_91 = arith.constant 0 : index
    %312 = vector.load %arg11[%311, %c0_90, %c0_91] : memref<8x8x64xbf16, #tpu.memory_space<vmem>>, vector<1x8x32xbf16>
    %313 = vector.shape_cast %312 : vector<1x8x32xbf16> to vector<8x32xbf16>
    %314 = vector.shape_cast %310 : vector<8x32xbf16> to vector<1x8x32xbf16>
    tpu.vector_store %arg11[%311, %c0_90, %c0_91], %314 {strides = array<i32>} : memref<8x8x64xbf16, #tpu.memory_space<vmem>>, vector<1x8x32xbf16>,
    %315 = vector.extract_strided_slice %309 {offsets = [0, 32], sizes = [8, 32], strides = [1, 1]} : vector<8x64xbf16> to vector<8x32xbf16>
    %316 = arith.index_cast %272 : i32 to index
    %c0_92 = arith.constant 0 : index
    %c32_93 = arith.constant 32 : index
    %317 = vector.load %arg11[%316, %c0_92, %c32_93] : memref<8x8x64xbf16, #tpu.memory_space<vmem>>, vector<1x8x32xbf16>
    %318 = vector.shape_cast %317 : vector<1x8x32xbf16> to vector<8x32xbf16>
    %319 = vector.shape_cast %315 : vector<8x32xbf16> to vector<1x8x32xbf16>
    tpu.vector_store %arg11[%316, %c0_92, %c32_93], %319 {strides = array<i32>} : memref<8x8x64xbf16, #tpu.memory_space<vmem>>, vector<1x8x32xbf16>,
    %c6_i32 = arith.constant 6 : i32
    %c7_i32_94 = arith.constant 7 : i32
    %320 = arith.subi %c7_i32_94, %c6_i32 : i32
    %cst_95 = arith.constant dense<0.000000e+00> : vector<8x256xf32>
    %321 = tpu.matmul %309, %10, %cst_95 {dimension_numbers = #tpu.dot_dimension_numbers<[1], [0], [0], [1], [0, 0, 1, 1], [], []>} : vector<8x64xbf16>, vector<64x256xbf16>, vector<8x256xf32> -> vector<8x256xf32>
    %322 = arith.index_cast %c6_i32 : i32 to index
    %c0_96 = arith.constant 0 : index
    %c0_97 = arith.constant 0 : index
    %323 = vector.load %arg10[%322, %c0_96, %c0_97] : memref<8x8x256xf32, #tpu.memory_space<vmem>>, vector<1x8x256xf32>
    %324 = vector.shape_cast %323 : vector<1x8x256xf32> to vector<8x256xf32>
    %325 = arith.index_cast %320 : i32 to index
    %c0_98 = arith.constant 0 : index
    %c0_99 = arith.constant 0 : index
    %326 = vector.load %arg10[%325, %c0_98, %c0_99] : memref<8x8x256xf32, #tpu.memory_space<vmem>>, vector<1x8x256xf32>
    %327 = vector.shape_cast %326 : vector<1x8x256xf32> to vector<8x256xf32>
    %328 = vector.shape_cast %29 : vector<1x256xi1> to vector<1x256xi1>
    %329 = vector.broadcast %328 : vector<1x256xi1> to vector<8x256xi1>
    %330 = arith.select %329, %324, %327 : vector<8x256xi1>, vector<8x256xf32>
    %331 = arith.addf %321, %330 : vector<8x256xf32>
    %332 = vector.extract_strided_slice %331 {offsets = [0, 0], sizes = [8, 64], strides = [1, 1]} : vector<8x256xf32> to vector<8x64xf32>
    %333 = arith.negf %332 : vector<8x64xf32>
    %334 = math.exp %333 : vector<8x64xf32>
    %cst_100 = arith.constant 1.000000e+00 : f32
    %335 = vector.broadcast %cst_100 : f32 to vector<8x64xf32>
    %336 = arith.addf %335, %334 : vector<8x64xf32>
    %337 = arith.divf %335, %336 : vector<8x64xf32>
    %338 = vector.extract_strided_slice %331 {offsets = [0, 64], sizes = [8, 64], strides = [1, 1]} : vector<8x256xf32> to vector<8x64xf32>
    %339 = arith.negf %338 : vector<8x64xf32>
    %340 = math.exp %339 : vector<8x64xf32>
    %cst_101 = arith.constant 1.000000e+00 : f32
    %341 = vector.broadcast %cst_101 : f32 to vector<8x64xf32>
    %342 = arith.addf %341, %340 : vector<8x64xf32>
    %343 = arith.divf %341, %342 : vector<8x64xf32>
    %344 = vector.extract_strided_slice %331 {offsets = [0, 128], sizes = [8, 64], strides = [1, 1]} : vector<8x256xf32> to vector<8x64xf32>
    %345 = math.tanh %344 : vector<8x64xf32>
    %346 = vector.extract_strided_slice %331 {offsets = [0, 192], sizes = [8, 64], strides = [1, 1]} : vector<8x256xf32> to vector<8x64xf32>
    %347 = arith.negf %346 : vector<8x64xf32>
    %348 = math.exp %347 : vector<8x64xf32>
    %cst_102 = arith.constant 1.000000e+00 : f32
    %349 = vector.broadcast %cst_102 : f32 to vector<8x64xf32>
    %350 = arith.addf %349, %348 : vector<8x64xf32>
    %351 = arith.divf %349, %350 : vector<8x64xf32>
    %352 = arith.mulf %343, %306 : vector<8x64xf32>
    %353 = arith.mulf %337, %345 : vector<8x64xf32>
    %354 = arith.addf %352, %353 : vector<8x64xf32>
    %355 = math.tanh %354 : vector<8x64xf32>
    %356 = arith.mulf %351, %355 : vector<8x64xf32>
    %357 = arith.truncf %356 : vector<8x64xf32> to vector<8x64xbf16>
    %358 = vector.extract_strided_slice %357 {offsets = [0, 0], sizes = [8, 32], strides = [1, 1]} : vector<8x64xbf16> to vector<8x32xbf16>
    %359 = arith.index_cast %c6_i32 : i32 to index
    %c0_103 = arith.constant 0 : index
    %c0_104 = arith.constant 0 : index
    %360 = vector.load %arg11[%359, %c0_103, %c0_104] : memref<8x8x64xbf16, #tpu.memory_space<vmem>>, vector<1x8x32xbf16>
    %361 = vector.shape_cast %360 : vector<1x8x32xbf16> to vector<8x32xbf16>
    %362 = vector.shape_cast %358 : vector<8x32xbf16> to vector<1x8x32xbf16>
    tpu.vector_store %arg11[%359, %c0_103, %c0_104], %362 {strides = array<i32>} : memref<8x8x64xbf16, #tpu.memory_space<vmem>>, vector<1x8x32xbf16>,
    %363 = vector.extract_strided_slice %357 {offsets = [0, 32], sizes = [8, 32], strides = [1, 1]} : vector<8x64xbf16> to vector<8x32xbf16>
    %364 = arith.index_cast %320 : i32 to index
    %c0_105 = arith.constant 0 : index
    %c32_106 = arith.constant 32 : index
    %365 = vector.load %arg11[%364, %c0_105, %c32_106] : memref<8x8x64xbf16, #tpu.memory_space<vmem>>, vector<1x8x32xbf16>
    %366 = vector.shape_cast %365 : vector<1x8x32xbf16> to vector<8x32xbf16>
    %367 = vector.shape_cast %363 : vector<8x32xbf16> to vector<1x8x32xbf16>
    tpu.vector_store %arg11[%364, %c0_105, %c32_106], %367 {strides = array<i32>} : memref<8x8x64xbf16, #tpu.memory_space<vmem>>, vector<1x8x32xbf16>,
    %c7_i32_107 = arith.constant 7 : i32
    %c7_i32_108 = arith.constant 7 : i32
    %368 = arith.subi %c7_i32_108, %c7_i32_107 : i32
    %cst_109 = arith.constant dense<0.000000e+00> : vector<8x256xf32>
    %369 = tpu.matmul %357, %10, %cst_109 {dimension_numbers = #tpu.dot_dimension_numbers<[1], [0], [0], [1], [0, 0, 1, 1], [], []>} : vector<8x64xbf16>, vector<64x256xbf16>, vector<8x256xf32> -> vector<8x256xf32>
    %370 = arith.index_cast %c7_i32_107 : i32 to index
    %c0_110 = arith.constant 0 : index
    %c0_111 = arith.constant 0 : index
    %371 = vector.load %arg10[%370, %c0_110, %c0_111] : memref<8x8x256xf32, #tpu.memory_space<vmem>>, vector<1x8x256xf32>
    %372 = vector.shape_cast %371 : vector<1x8x256xf32> to vector<8x256xf32>
    %373 = arith.index_cast %368 : i32 to index
    %c0_112 = arith.constant 0 : index
    %c0_113 = arith.constant 0 : index
    %374 = vector.load %arg10[%373, %c0_112, %c0_113] : memref<8x8x256xf32, #tpu.memory_space<vmem>>, vector<1x8x256xf32>
    %375 = vector.shape_cast %374 : vector<1x8x256xf32> to vector<8x256xf32>
    %376 = vector.shape_cast %29 : vector<1x256xi1> to vector<1x256xi1>
    %377 = vector.broadcast %376 : vector<1x256xi1> to vector<8x256xi1>
    %378 = arith.select %377, %372, %375 : vector<8x256xi1>, vector<8x256xf32>
    %379 = arith.addf %369, %378 : vector<8x256xf32>
    %380 = vector.extract_strided_slice %379 {offsets = [0, 0], sizes = [8, 64], strides = [1, 1]} : vector<8x256xf32> to vector<8x64xf32>
    %381 = arith.negf %380 : vector<8x64xf32>
    %382 = math.exp %381 : vector<8x64xf32>
    %cst_114 = arith.constant 1.000000e+00 : f32
    %383 = vector.broadcast %cst_114 : f32 to vector<8x64xf32>
    %384 = arith.addf %383, %382 : vector<8x64xf32>
    %385 = arith.divf %383, %384 : vector<8x64xf32>
    %386 = vector.extract_strided_slice %379 {offsets = [0, 64], sizes = [8, 64], strides = [1, 1]} : vector<8x256xf32> to vector<8x64xf32>
    %387 = arith.negf %386 : vector<8x64xf32>
    %388 = math.exp %387 : vector<8x64xf32>
    %cst_115 = arith.constant 1.000000e+00 : f32
    %389 = vector.broadcast %cst_115 : f32 to vector<8x64xf32>
    %390 = arith.addf %389, %388 : vector<8x64xf32>
    %391 = arith.divf %389, %390 : vector<8x64xf32>
    %392 = vector.extract_strided_slice %379 {offsets = [0, 128], sizes = [8, 64], strides = [1, 1]} : vector<8x256xf32> to vector<8x64xf32>
    %393 = math.tanh %392 : vector<8x64xf32>
    %394 = vector.extract_strided_slice %379 {offsets = [0, 192], sizes = [8, 64], strides = [1, 1]} : vector<8x256xf32> to vector<8x64xf32>
    %395 = arith.negf %394 : vector<8x64xf32>
    %396 = math.exp %395 : vector<8x64xf32>
    %cst_116 = arith.constant 1.000000e+00 : f32
    %397 = vector.broadcast %cst_116 : f32 to vector<8x64xf32>
    %398 = arith.addf %397, %396 : vector<8x64xf32>
    %399 = arith.divf %397, %398 : vector<8x64xf32>
    %400 = arith.mulf %391, %354 : vector<8x64xf32>
    %401 = arith.mulf %385, %393 : vector<8x64xf32>
    %402 = arith.addf %400, %401 : vector<8x64xf32>
    %403 = math.tanh %402 : vector<8x64xf32>
    %404 = arith.mulf %399, %403 : vector<8x64xf32>
    %405 = arith.truncf %404 : vector<8x64xf32> to vector<8x64xbf16>
    %406 = vector.extract_strided_slice %405 {offsets = [0, 0], sizes = [8, 32], strides = [1, 1]} : vector<8x64xbf16> to vector<8x32xbf16>
    %407 = arith.index_cast %c7_i32_107 : i32 to index
    %c0_117 = arith.constant 0 : index
    %c0_118 = arith.constant 0 : index
    %408 = vector.load %arg11[%407, %c0_117, %c0_118] : memref<8x8x64xbf16, #tpu.memory_space<vmem>>, vector<1x8x32xbf16>
    %409 = vector.shape_cast %408 : vector<1x8x32xbf16> to vector<8x32xbf16>
    %410 = vector.shape_cast %406 : vector<8x32xbf16> to vector<1x8x32xbf16>
    tpu.vector_store %arg11[%407, %c0_117, %c0_118], %410 {strides = array<i32>} : memref<8x8x64xbf16, #tpu.memory_space<vmem>>, vector<1x8x32xbf16>,
    %411 = vector.extract_strided_slice %405 {offsets = [0, 32], sizes = [8, 32], strides = [1, 1]} : vector<8x64xbf16> to vector<8x32xbf16>
    %412 = arith.index_cast %368 : i32 to index
    %c0_119 = arith.constant 0 : index
    %c32_120 = arith.constant 32 : index
    %413 = vector.load %arg11[%412, %c0_119, %c32_120] : memref<8x8x64xbf16, #tpu.memory_space<vmem>>, vector<1x8x32xbf16>
    %414 = vector.shape_cast %413 : vector<1x8x32xbf16> to vector<8x32xbf16>
    %415 = vector.shape_cast %411 : vector<8x32xbf16> to vector<1x8x32xbf16>
    tpu.vector_store %arg11[%412, %c0_119, %c32_120], %415 {strides = array<i32>} : memref<8x8x64xbf16, #tpu.memory_space<vmem>>, vector<1x8x32xbf16>,
    %c8_i32 = arith.constant 8 : i32
    %c0_121 = arith.constant 0 : index
    %c0_122 = arith.constant 0 : index
    %c0_123 = arith.constant 0 : index
    %416 = vector.load %arg1[%c0_121, %c0_122, %c0_123] : memref<8x8x16xf32, #tpu.memory_space<vmem>>, vector<8x8x16xf32>
    %417 = vector.shape_cast %416 : vector<8x8x16xf32> to vector<64x16xf32>
    %c0_124 = arith.constant 0 : index
    %c0_125 = arith.constant 0 : index
    %c0_126 = arith.constant 0 : index
    %418 = vector.load %arg11[%c0_124, %c0_125, %c0_126] : memref<8x8x64xbf16, #tpu.memory_space<vmem>>, vector<8x8x64xbf16>
    %419 = vector.shape_cast %418 : vector<8x8x64xbf16> to vector<64x64xbf16>
    %c0_127 = arith.constant 0 : index
    %c0_128 = arith.constant 0 : index
    %420 = vector.load %arg5[%c0_127, %c0_128] : memref<64x32xbf16, #tpu.memory_space<vmem>>, vector<64x32xbf16>
    %cst_129 = arith.constant dense<0.000000e+00> : vector<64x32xf32>
    %421 = tpu.matmul %419, %420, %cst_129 {dimension_numbers = #tpu.dot_dimension_numbers<[1], [0], [0], [1], [0, 0, 1, 1], [], []>} : vector<64x64xbf16>, vector<64x32xbf16>, vector<64x32xf32> -> vector<64x32xf32>
    %c0_130 = arith.constant 0 : index
    %c0_131 = arith.constant 0 : index
    %422 = vector.load %arg6[%c0_130, %c0_131] : memref<1x32xf32, #tpu.memory_space<vmem>>, vector<1x32xf32>
    %423 = vector.broadcast %422 : vector<1x32xf32> to vector<64x32xf32>
    %424 = arith.addf %421, %423 : vector<64x32xf32>
    %425 = vector.extract_strided_slice %424 {offsets = [0, 0], sizes = [64, 16], strides = [1, 1]} : vector<64x32xf32> to vector<64x16xf32>
    %426 = vector.extract_strided_slice %424 {offsets = [0, 16], sizes = [64, 16], strides = [1, 1]} : vector<64x32xf32> to vector<64x16xf32>
    %427 = arith.mulf %425, %426 : vector<64x16xf32>
    %428 = tpu.concatenate %427, %417 in 1 : vector<64x16xf32>, vector<64x16xf32> -> vector<64x32xf32>
    %429 = arith.truncf %428 : vector<64x32xf32> to vector<64x32xbf16>
    %c0_132 = arith.constant 0 : index
    %c0_133 = arith.constant 0 : index
    %430 = vector.load %arg7[%c0_132, %c0_133] : memref<32x16xbf16, #tpu.memory_space<vmem>>, vector<32x16xbf16>
    %cst_134 = arith.constant dense<0.000000e+00> : vector<64x16xf32>
    %431 = tpu.matmul %429, %430, %cst_134 {dimension_numbers = #tpu.dot_dimension_numbers<[1], [0], [0], [1], [0, 0, 1, 1], [], []>} : vector<64x32xbf16>, vector<32x16xbf16>, vector<64x16xf32> -> vector<64x16xf32>
    %c0_135 = arith.constant 0 : index
    %c0_136 = arith.constant 0 : index
    %432 = vector.load %arg8[%c0_135, %c0_136] : memref<1x16xf32, #tpu.memory_space<vmem>>, vector<1x16xf32>
    %433 = vector.broadcast %432 : vector<1x16xf32> to vector<64x16xf32>
    %434 = arith.addf %431, %433 : vector<64x16xf32>
    %435 = arith.addf %434, %417 : vector<64x16xf32>
    %436 = vector.shape_cast %435 : vector<64x16xf32> to vector<8x8x16xf32>
    %c0_137 = arith.constant 0 : index
    %c0_138 = arith.constant 0 : index
    %c0_139 = arith.constant 0 : index
    %437 = vector.load %arg9[%c0_137, %c0_138, %c0_139] : memref<8x8x16xf32, #tpu.memory_space<vmem>>, vector<8x8x16xf32>
    tpu.vector_store %arg9[%c0_137, %c0_138, %c0_139], %436 {strides = array<i32>} : memref<8x8x16xf32, #tpu.memory_space<vmem>>, vector<8x8x16xf32>,
    return
  }
  func.func @transform_0(%arg0: i32) -> (i32, i32, i32) {
    %c0_i32 = arith.constant 0 : i32
    %c0_i32_0 = arith.constant 0 : i32
    %c0_i32_1 = arith.constant 0 : i32
    return %c0_i32, %arg0, %c0_i32_0 : i32, i32, i32
  }
  func.func @transform_1(%arg0: i32) -> (i32, i32) {
    %c0_i32 = arith.constant 0 : i32
    %c0_i32_0 = arith.constant 0 : i32
    %c0_i32_1 = arith.constant 0 : i32
    return %c0_i32, %c0_i32_0 : i32, i32
  }
  func.func @transform_2(%arg0: i32) -> (i32, i32) {
    %c0_i32 = arith.constant 0 : i32
    %c0_i32_0 = arith.constant 0 : i32
    %c0_i32_1 = arith.constant 0 : i32
    return %c0_i32, %c0_i32_0 : i32, i32
  }
  func.func @transform_3(%arg0: i32) -> (i32, i32) {
    %c0_i32 = arith.constant 0 : i32
    %c0_i32_0 = arith.constant 0 : i32
    %c0_i32_1 = arith.constant 0 : i32
    return %c0_i32, %c0_i32_0 : i32, i32
  }
  func.func @transform_4(%arg0: i32) -> (i32, i32) {
    %c0_i32 = arith.constant 0 : i32
    %c0_i32_0 = arith.constant 0 : i32
    %c0_i32_1 = arith.constant 0 : i32
    return %c0_i32, %c0_i32_0 : i32, i32
  }
  func.func @transform_5(%arg0: i32) -> (i32, i32) {
    %c0_i32 = arith.constant 0 : i32
    %c0_i32_0 = arith.constant 0 : i32
    %c0_i32_1 = arith.constant 0 : i32
    return %c0_i32, %c0_i32_0 : i32, i32
  }
  func.func @transform_6(%arg0: i32) -> (i32, i32) {
    %c0_i32 = arith.constant 0 : i32
    %c0_i32_0 = arith.constant 0 : i32
    %c0_i32_1 = arith.constant 0 : i32
    return %c0_i32, %c0_i32_0 : i32, i32
  }
  func.func @transform_7(%arg0: i32) -> (i32, i32) {
    %c0_i32 = arith.constant 0 : i32
    %c0_i32_0 = arith.constant 0 : i32
    %c0_i32_1 = arith.constant 0 : i32
    return %c0_i32, %c0_i32_0 : i32, i32
  }
  func.func @transform_8(%arg0: i32) -> (i32, i32, i32) {
    %c0_i32 = arith.constant 0 : i32
    %c0_i32_0 = arith.constant 0 : i32
    %c0_i32_1 = arith.constant 0 : i32
    return %c0_i32, %arg0, %c0_i32_0 : i32, i32, i32
  }
}

module attributes {stable_mosaic.version = 11 : i64} {
  func.func @_head_kernel(%arg0: i32, %arg1: memref<128x16xf32, #tpu.memory_space<vmem>>, %arg2: memref<1x1xf32, #tpu.memory_space<vmem>>, %arg3: memref<16x32xbf16, #tpu.memory_space<vmem>>, %arg4: memref<1x32xf32, #tpu.memory_space<vmem>>, %arg5: memref<128x32xf32, #tpu.memory_space<vmem>>) attributes {dimension_semantics = [#tpu.dimension_semantics<parallel>], iteration_bounds = array<i64: 1>, scalar_prefetch = 0 : i64, scratch_operands = 0 : i64, tpu.core_type = #tpu.core_type<tc>, window_params = [{transform_indices = @transform_0, window_bounds = array<i64: 128, 16>}, {pipeline_mode = #tpu.pipeline_mode<synchronous>, transform_indices = @transform_1, window_bounds = array<i64: 1, 1>}, {pipeline_mode = #tpu.pipeline_mode<synchronous>, transform_indices = @transform_2, window_bounds = array<i64: 16, 32>}, {pipeline_mode = #tpu.pipeline_mode<synchronous>, transform_indices = @transform_3, window_bounds = array<i64: 1, 32>}, {transform_indices = @transform_4, window_bounds = array<i64: 128, 32>}]} {
    %c0 = arith.constant 0 : index
    %c0_0 = arith.constant 0 : index
    %0 = vector.load %arg1[%c0, %c0_0] : memref<128x16xf32, #tpu.memory_space<vmem>>, vector<128x16xf32>
    %cst = arith.constant 0.000000e+00 : f32
    %1 = vector.broadcast %cst : f32 to vector<128x16xf32>
    %2 = arith.cmpf ogt, %0, %1 : vector<128x16xf32>
    %c0_1 = arith.constant 0 : index
    %c0_2 = arith.constant 0 : index
    %3 = vector.load %arg2[%c0_1, %c0_2] : memref<1x1xf32, #tpu.memory_space<vmem>>, vector<1x1xf32>
    %4 = vector.broadcast %3 : vector<1x1xf32> to vector<128x16xf32>
    %5 = arith.mulf %0, %4 : vector<128x16xf32>
    %6 = arith.select %2, %0, %5 : vector<128x16xi1>, vector<128x16xf32>
    %7 = arith.truncf %6 : vector<128x16xf32> to vector<128x16xbf16>
    %c0_3 = arith.constant 0 : index
    %c0_4 = arith.constant 0 : index
    %8 = vector.load %arg3[%c0_3, %c0_4] : memref<16x32xbf16, #tpu.memory_space<vmem>>, vector<16x32xbf16>
    %cst_5 = arith.constant dense<0.000000e+00> : vector<128x32xf32>
    %9 = tpu.matmul %7, %8, %cst_5 {dimension_numbers = #tpu.dot_dimension_numbers<[1], [0], [0], [1], [0, 0, 1, 1], [], []>} : vector<128x16xbf16>, vector<16x32xbf16>, vector<128x32xf32> -> vector<128x32xf32>
    %c0_6 = arith.constant 0 : index
    %c0_7 = arith.constant 0 : index
    %10 = vector.load %arg4[%c0_6, %c0_7] : memref<1x32xf32, #tpu.memory_space<vmem>>, vector<1x32xf32>
    %11 = vector.broadcast %10 : vector<1x32xf32> to vector<128x32xf32>
    %12 = arith.addf %9, %11 : vector<128x32xf32>
    %c0_8 = arith.constant 0 : index
    %c0_9 = arith.constant 0 : index
    %13 = vector.load %arg5[%c0_8, %c0_9] : memref<128x32xf32, #tpu.memory_space<vmem>>, vector<128x32xf32>
    tpu.vector_store %arg5[%c0_8, %c0_9], %12 {strides = array<i32>} : memref<128x32xf32, #tpu.memory_space<vmem>>, vector<128x32xf32>,
    return
  }
  func.func @transform_0(%arg0: i32) -> (i32, i32) {
    %c0_i32 = arith.constant 0 : i32
    %c0_i32_0 = arith.constant 0 : i32
    return %arg0, %c0_i32 : i32, i32
  }
  func.func @transform_1(%arg0: i32) -> (i32, i32) {
    %c0_i32 = arith.constant 0 : i32
    %c0_i32_0 = arith.constant 0 : i32
    %c0_i32_1 = arith.constant 0 : i32
    return %c0_i32, %c0_i32_0 : i32, i32
  }
  func.func @transform_2(%arg0: i32) -> (i32, i32) {
    %c0_i32 = arith.constant 0 : i32
    %c0_i32_0 = arith.constant 0 : i32
    %c0_i32_1 = arith.constant 0 : i32
    return %c0_i32, %c0_i32_0 : i32, i32
  }
  func.func @transform_3(%arg0: i32) -> (i32, i32) {
    %c0_i32 = arith.constant 0 : i32
    %c0_i32_0 = arith.constant 0 : i32
    %c0_i32_1 = arith.constant 0 : i32
    return %c0_i32, %c0_i32_0 : i32, i32
  }
  func.func @transform_4(%arg0: i32) -> (i32, i32) {
    %c0_i32 = arith.constant 0 : i32
    %c0_i32_0 = arith.constant 0 : i32
    return %arg0, %c0_i32 : i32, i32
  }
}

</mosaic_0001>

<bundles_post_ra>
// kernel: _lambda_.5
= control target key start
LH: loop header
LB: loop body
LE: loop exit
PB: predicated region body
PF: predicated region fallthrough
CT: control target
= control target key end

     0   :  { %v226_v0 = vmov 0   ;;  %vm111_vm5 = vcmask 130048   ;;  %s391_s1 = inlined_call_operand.<no memory space> [shape: f32[1,1], index: 1, kind: input, shape index: {}]   ;;  %s392_s3 = inlined_call_operand.vmem [shape: f32[1,32], index: 3, kind: input, shape index: {}]   ;;  %s393_s2 = inlined_call_operand.vmem [shape: bf16[16,32], index: 2, kind: input, shape index: {}]   ;;  %s394_s0 = inlined_call_operand.vmem [shape: f32[128,16], index: 0, kind: input, shape index: {}]   ;;  %s395_s4 = inlined_call_operand.vmem [shape: f32[128,32], index: 4, kind: output, shape index: {}]  }
   0x1   :  { %223 = vset.pattern.permute.xlu0 %v226_v0  ;;  %v9_v1 = vstv %s391_s1  ;;  %v218_v3 = vld [vmem:[%s393_s2] sm:$0xff]  ;;  %v21_v5 = vld [vmem:[%s394_s0 + $0x8] sm:$0xff]  ;;  %v22_v33 = vld [vmem:[%s394_s0 + $0x10] sm:$0xff] }
   0x2   :  { %10 = vst [vmem:[#allocation2] sm:$0x1] %v9_v1  ;;  %143 = vmatpush.bf16.msra.mxu0 %v218_v3  ;;  %219 = vmatpush.bf16.msra.mxu1 %v218_v3  ;;  %v20_v4 = vld [vmem:[%s394_s0] sm:$0xff]  ;;  %v25_v7 = vld [vmem:[%s394_s0 + $0x28] sm:$0xff]  ;;  %vm37_vm1 = vcmp.gt.f32.partialorder %v21_v5, 0.0  ;;  %v23_v34 = vld [vmem:[%s394_s0 + $0x18] sm:$0xff] }
   0x3   :  { %220 = vmatpush.bf16.msra.mxu2 %v218_v3  ;;  %221 = vmatpush.bf16.msra.mxu3 %v218_v3  ;;  %v24_v6 = vld [vmem:[%s394_s0 + $0x20] sm:$0xff]  ;;  %v29_v9 = vld [vmem:[%s394_s0 + $0x48] sm:$0xff]  ;;  %vm36_vm0 = vcmp.gt.f32.partialorder %v20_v4, 0.0  ;;  %vm41_vm3 = vcmp.gt.f32.partialorder %v25_v7, 0.0  ;;  %v26_v35 = vld [vmem:[%s394_s0 + $0x30] sm:$0xff]  ;;  %vm38_vm9 = vcmp.gt.f32.partialorder %v22_v33, 0.0 }
   0x4   :  { %v28_v8 = vld [vmem:[%s394_s0 + $0x40] sm:$0xff]  ;;  %v33_v11 = vld [vmem:[%s394_s0 + $0x68] sm:$0xff]  ;;  %vm40_vm2 = vcmp.gt.f32.partialorder %v24_v6, 0.0  ;;  %vm45_vm6 = vcmp.gt.f32.partialorder %v29_v9, 0.0  ;;  %v27_v36 = vld [vmem:[%s394_s0 + $0x38] sm:$0xff]  ;;  %vm39_vm10 = vcmp.gt.f32.partialorder %v23_v34, 0.0 }
   0x5   :  { %v32_v10 = vld [vmem:[%s394_s0 + $0x60] sm:$0xff]  ;;  %vm44_vm4 = vcmp.gt.f32.partialorder %v28_v8, 0.0  ;;  %vm49_vm8 = vcmp.gt.f32.partialorder %v33_v11, 0.0  ;;  %v30_v37 = vld [vmem:[%s394_s0 + $0x50] sm:$0xff]  ;;  %v31_v38 = vld [vmem:[%s394_s0 + $0x58] sm:$0xff]  ;;  %vm42_vm11 = vcmp.gt.f32.partialorder %v26_v35, 0.0 }
   0x6   :  { %vm48_vm7 = vcmp.gt.f32.partialorder %v32_v10, 0.0  ;;  %v34_v39 = vld [vmem:[%s394_s0 + $0x70] sm:$0xff]  ;;  %v35_v40 = vld [vmem:[%s394_s0 + $0x78] sm:$0xff]  ;;  %vm43_vm12 = vcmp.gt.f32.partialorder %v27_v36, 0.0  ;;  %vm46_vm13 = vcmp.gt.f32.partialorder %v30_v37, 0.0  ;;  %vm47_vm14 = vcmp.gt.f32.partialorder %v31_v38, 0.0 }
   0x7   :  { %vm50_vm15 = vcmp.gt.f32.partialorder %v34_v39, 0.0  ;;  %v225_v61 = vld [vmem:[%s392_s3] ss:$0 sm:$0xff] }
   0x9   :  { %v224_v2 = vld [vmem:[#allocation2] ss:$0 sm:$0xff] }
   0xa   :  { %56 = vperm.xlu0 %223, %v224_v2  }
  0x7c   :  { %v57_v12 = vpop.permute.xlu0 %56 }
  0x7d   :  { %v59_v13 = vmul.f32 %v57_v12, %v20_v4  ;;  %v60_v14 = vmul.f32 %v57_v12, %v21_v5  ;;  %v63_v15 = vmul.f32 %v57_v12, %v24_v6  ;;  %v64_v16 = vmul.f32 %v57_v12, %v25_v7 }
  0x7e   :  { %v67_v17 = vmul.f32 %v57_v12, %v28_v8  ;;  %v68_v18 = vmul.f32 %v57_v12, %v29_v9  ;;  %v71_v19 = vmul.f32 %v57_v12, %v32_v10  ;;  %v72_v20 = vmul.f32 %v57_v12, %v33_v11 }
  0x7f   :  { %v75_v21 = vsel %vm36_vm0, %v20_v4, %v59_v13  ;;  %v76_v22 = vsel %vm37_vm1, %v21_v5, %v60_v14  ;;  %v79_v23 = vsel %vm40_vm2, %v24_v6, %v63_v15  ;;  %v80_v24 = vsel %vm41_vm3, %v25_v7, %v64_v16 }
  0x80   :  { %v91_v25 = vpack.c.bf16 %v76_v22, %v75_v21  ;;  %v93_v26 = vpack.c.bf16 %v80_v24, %v79_v23  ;;  %v83_v27 = vsel %vm44_vm4, %v28_v8, %v67_v17  ;;  %v84_v28 = vsel %vm45_vm6, %v29_v9, %v68_v18 }
  0x81   :  { %v95_v29 = vpack.c.bf16 %v84_v28, %v83_v27  ;;  %v87_v30 = vsel %vm48_vm7, %v32_v10, %v71_v19  ;;  %v88_v31 = vsel %vm49_vm8, %v33_v11, %v72_v20  ;;  %v61_v41 = vmul.f32 %v57_v12, %v22_v33 }
  0x82   :  { %210 = vmatmul.msk.bf16.vlgmr.msra.gmra.mxu0 %vm111_vm5, %v91_v25  ;;  %212 = vmatmul.msk.bf16.vlgmr.msra.gmra.mxu1 %vm111_vm5, %v93_v26  ;;  %v97_v32 = vpack.c.bf16 %v88_v31, %v87_v30  ;;  %v62_v42 = vmul.f32 %v57_v12, %v23_v34  ;;  %v65_v43 = vmul.f32 %v57_v12, %v26_v35  ;;  %vm51_vm0 = vcmp.gt.f32.partialorder %v35_v40, 0.0 }
  0x83   :  { %214 = vmatmul.msk.bf16.vlgmr.msra.gmra.mxu2 %vm111_vm5, %v95_v29  ;;  %v66_v44 = vmul.f32 %v57_v12, %v27_v36  ;;  %v69_v45 = vmul.f32 %v57_v12, %v30_v37  ;;  %v70_v46 = vmul.f32 %v57_v12, %v31_v38  ;;  %v73_v47 = vmul.f32 %v57_v12, %v34_v39 }
  0x84   :  { %216 = vmatmul.msk.bf16.vlgmr.msra.gmra.mxu3 %vm111_vm5, %v97_v32  ;;  %v74_v48 = vmul.f32 %v57_v12, %v35_v40  ;;  %v77_v49 = vsel %vm38_vm9, %v22_v33, %v61_v41  ;;  %v78_v50 = vsel %vm39_vm10, %v23_v34, %v62_v42  ;;  %v81_v51 = vsel %vm42_vm11, %v26_v35, %v65_v43 }
  0x85   :  { %v82_v52 = vsel %vm43_vm12, %v27_v36, %v66_v44  ;;  %v85_v53 = vsel %vm46_vm13, %v30_v37, %v69_v45  ;;  %v86_v54 = vsel %vm47_vm14, %v31_v38, %v70_v46  ;;  %v89_v55 = vsel %vm50_vm15, %v34_v39, %v73_v47 }
  0x86   :  { %v90_v56 = vsel %vm51_vm0, %v35_v40, %v74_v48  ;;  %v92_v57 = vpack.c.bf16 %v78_v50, %v77_v49  ;;  %v94_v58 = vpack.c.bf16 %v82_v52, %v81_v51  ;;  %v96_v59 = vpack.c.bf16 %v86_v54, %v85_v53 }
  0x87   :  { %v98_v60 = vpack.c.bf16 %v90_v56, %v89_v55  ;;  %vm185_vm1 = vcmask 261120  }
  0x92   :  { %211 = vmatmul.msk.bf16.gmra.mxu0 %vm111_vm5, %v92_v57  ;;  %213 = vmatmul.msk.bf16.gmra.mxu1 %vm111_vm5, %v94_v58 }
  0x93   :  { %215 = vmatmul.msk.bf16.gmra.mxu2 %vm111_vm5, %v96_v59 }
  0x94   :  { %217 = vmatmul.msk.bf16.gmra.mxu3 %vm111_vm5, %v98_v60 }
  0xff   :  { %v145_v62 = vpop.f32.mrf.mxu0  ;;  %v155_v63 = vpop.f32.mrf.mxu1 }
 0x100   :  { %v146_v0 = vadd.f32 %v225_v61, %v145_v62  ;;  %v156_v1 = vadd.f32 %v225_v61, %v155_v63 }
 0x102   :  { %186 = vst.msk [vmem:[%s395_s4] sm:$0xff] %vm185_vm1, %v146_v0 }
 0x103   :  { %190 = vst.msk [vmem:[%s395_s4 + $0x20] sm:$0xff] %vm185_vm1, %v156_v1 }
 0x106   :  { %v165_v2 = vpop.f32.mrf.mxu2 }
 0x107   :  { %v166_v3 = vadd.f32 %v225_v61, %v165_v2  ;;  %v175_v4 = vpop.f32.mrf.mxu3  ;;  %v147_v5 = vpop.f32.mrf.mxu0 }
 0x108   :  { %v176_v6 = vadd.f32 %v225_v61, %v175_v4  ;;  %v148_v7 = vadd.f32 %v225_v61, %v147_v5  ;;  %v157_v8 = vpop.f32.mrf.mxu1 }
 0x109   :  { %194 = vst.msk [vmem:[%s395_s4 + $0x40] sm:$0xff] %vm185_vm1, %v166_v3  ;;  %v158_v9 = vadd.f32 %v225_v61, %v157_v8 }
 0x10a   :  { %198 = vst.msk [vmem:[%s395_s4 + $0x60] sm:$0xff] %vm185_vm1, %v176_v6 }
 0x10b   :  { %187 = vst.msk [vmem:[%s395_s4 + $0x8] sm:$0xff] %vm185_vm1, %v148_v7 }
 0x10c   :  { %191 = vst.msk [vmem:[%s395_s4 + $0x28] sm:$0xff] %vm185_vm1, %v158_v9 }
 0x10e   :  { %v167_v10 = vpop.f32.mrf.mxu2 }
 0x10f   :  { %v168_v11 = vadd.f32 %v225_v61, %v167_v10  ;;  %v177_v12 = vpop.f32.mrf.mxu3  ;;  %v150_v13 = vpop.f32.mrf.mxu0 }
 0x110   :  { %v178_v14 = vadd.f32 %v225_v61, %v177_v12  ;;  %v151_v15 = vadd.f32 %v225_v61, %v150_v13  ;;  %v160_v16 = vpop.f32.mrf.mxu1 }
 0x111   :  { %195 = vst.msk [vmem:[%s395_s4 + $0x48] sm:$0xff] %vm185_vm1, %v168_v11  ;;  %v161_v17 = vadd.f32 %v225_v61, %v160_v16 }
 0x112   :  { %199 = vst.msk [vmem:[%s395_s4 + $0x68] sm:$0xff] %vm185_vm1, %v178_v14 }
 0x113   :  { %188 = vst.msk [vmem:[%s395_s4 + $0x10] sm:$0xff] %vm185_vm1, %v151_v15 }
 0x114   :  { %192 = vst.msk [vmem:[%s395_s4 + $0x30] sm:$0xff] %vm185_vm1, %v161_v17 }
 0x116   :  { %v170_v18 = vpop.f32.mrf.mxu2 }
 0x117   :  { %v171_v19 = vadd.f32 %v225_v61, %v170_v18  ;;  %v180_v20 = vpop.f32.mrf.mxu3  ;;  %v152_v21 = vpop.f32.mrf.mxu0 }
 0x118   :  { %v181_v22 = vadd.f32 %v225_v61, %v180_v20  ;;  %v153_v23 = vadd.f32 %v225_v61, %v152_v21  ;;  %v162_v24 = vpop.f32.mrf.mxu1 }
 0x119   :  { %196 = vst.msk [vmem:[%s395_s4 + $0x50] sm:$0xff] %vm185_vm1, %v171_v19  ;;  %v163_v25 = vadd.f32 %v225_v61, %v162_v24 }
 0x11a   :  { %200 = vst.msk [vmem:[%s395_s4 + $0x70] sm:$0xff] %vm185_vm1, %v181_v22 }
 0x11b   :  { %189 = vst.msk [vmem:[%s395_s4 + $0x18] sm:$0xff] %vm185_vm1, %v153_v23 }
 0x11c   :  { %193 = vst.msk [vmem:[%s395_s4 + $0x38] sm:$0xff] %vm185_vm1, %v163_v25 }
 0x11e   :  { %v172_v26 = vpop.f32.mrf.mxu2 }
 0x11f   :  { %v173_v27 = vadd.f32 %v225_v61, %v172_v26  ;;  %v182_v28 = vpop.f32.mrf.mxu3 }
 0x120   :  { %v183_v29 = vadd.f32 %v225_v61, %v182_v28 }
 0x121   :  { %197 = vst.msk [vmem:[%s395_s4 + $0x58] sm:$0xff] %vm185_vm1, %v173_v27 }
 0x122   :  { %201 = vst.msk [vmem:[%s395_s4 + $0x78] sm:$0xff] %vm185_vm1, %v183_v29 }

// kernel: _lambda_.3
= control target key start
LH: loop header
LB: loop body
LE: loop exit
PB: predicated region body
PF: predicated region fallthrough
CT: control target
= control target key end

     0   :  { %s2108_s27 = smov 0   ;;  %s2110_s28 = smov 0   ;;  %s2706_s0 = inlined_call_operand.vmem [shape: f32[8,16,16], index: 0, kind: input, shape index: {}]   ;;  %s2707_s1 = inlined_call_operand.vmem [shape: bf16[16,256], index: 1, kind: input, shape index: {}]   ;;  %s2708_s2 = inlined_call_operand.vmem [shape: bf16[64,256], index: 2, kind: input, shape index: {}]   ;;  %s2709_s3 = inlined_call_operand.vmem [shape: f32[1,256], index: 3, kind: input, shape index: {}]   ;;  %s2710_s4 = inlined_call_operand.vmem [shape: bf16[64,32], index: 4, kind: input, shape index: {}]   ;;  %s2711_s5 = inlined_call_operand.vmem [shape: f32[1,32], index: 5, kind: input, shape index: {}]   ;;  %s2712_s6 = inlined_call_operand.vmem [shape: bf16[32,16], index: 6, kind: input, shape index: {}]   ;;  %s2713_s7 = inlined_call_operand.vmem [shape: f32[1,16], index: 7, kind: input, shape index: {}]   ;;  %s2714_s8 = inlined_call_operand.vmem [shape: f32[8,16,16], index: 8, kind: output, shape index: {}]  }
   0x1   :  { %s2112_s29 = smov 0  }
   0x2 LB: > { %s1728_s30 = sadd.s32 4294967295, %s2057_s29   ;;  %s2125_s9 = sadd.s32 1, %s2057_s29   ;;  %s2057_s29 = sphi %s2112_s29, %s2722_s29   ;;  %s2053_s28 = sphi %s2110_s28, %s2721_s28   ;;  %s2049_s27 = sphi %s2108_s27, %s2720_s27  }
   0x3   : > { %s22_s10 = ssub.s32 %s2057_s29, %s2125_s9  ;;  %s25_s11 = sadd.s32 1, %s2053_s28 }
   0x4   : > { %p23_p0 = scmp.eq.s32.totalorder %s22_s10, 0  ;;  %p32_p1 = scmp.ne.s32.totalorder %s2053_s28, %s2049_s27 }
   0x5   : > { %p33_p2 = scmp.eq.s32.totalorder %s2057_s29, 0  ;;  %p209_p3 = scmp.eq.s32.totalorder %s1728_s30, 1 }
   0x6   : > { %s2136_s12 = scalar_select %p23_p0, %s2053_s28, %s25_s11  }
   0x7   : > { %p34_p4 = por %p33_p2, %p32_p1  ;;  %p2138_p5 = por %p209_p3, %p32_p1 }
   0x8   : > { %p1731_p6 = scmp.ge.s32.totalorder %s2057_s29, 2 }
   0xa   : > { %252 = sbr.rel (%p1731_p6) target bundleno = 27 (0x1b), region = 44 }
   0xf   : > { %255 = sbr.rel (!%p34_p4) target bundleno = 27 (0x1b), region = 48  ;;  %s257_s14 = sand.u32 (%p34_p4), 1, %s2053_s28  }
  0x10   : > { %s1733_s15 = sshll.u32 (%p34_p4), %s2057_s29, 3  ;;  %s1732_s16 = sshll.u32 (%p34_p4), %s257_s14, 6 }
  0x11   : > { %s261_s19 = scalar_lea.vmem (%p34_p4), %s2706_s0, %s1733_s15  ;;  %s259_s20 = scalar_lea.vmem (%p34_p4), [#allocation4], %s1732_s16 }
  0x12   : > { %v304_v0 = vld [vmem:[%s261_s19] sm:$0xff] (%p34_p4)  ;;  %v306_v1 = vld [vmem:[%s261_s19 + $0x10] sm:$0xff] (%p34_p4) }
  0x13   : > { %v308_v2 = vld [vmem:[%s261_s19 + $0x20] sm:$0xff] (%p34_p4)  ;;  %305 = vst [vmem:[%s259_s20] sm:$0xff] (%p34_p4), %v304_v0  ;;  %v310_v3 = vld [vmem:[%s261_s19 + $0x30] sm:$0xff] (%p34_p4) }
  0x14   : > { %307 = vst [vmem:[%s259_s20 + $0x8] sm:$0xff] %v306_v1  ;;  %v312_v4 = vld [vmem:[%s261_s19 + $0x40] sm:$0xff]  ;;  %v314_v5 = vld [vmem:[%s261_s19 + $0x50] sm:$0xff] }
  0x15   : > { %309 = vst [vmem:[%s259_s20 + $0x10] sm:$0xff] %v308_v2  ;;  %v316_v6 = vld [vmem:[%s261_s19 + $0x60] sm:$0xff]  ;;  %v318_v7 = vld [vmem:[%s261_s19 + $0x70] sm:$0xff] }
  0x16   : > { %311 = vst [vmem:[%s259_s20 + $0x18] sm:$0xff] %v310_v3 }
  0x17   : > { %313 = vst [vmem:[%s259_s20 + $0x20] sm:$0xff] %v312_v4 }
  0x18   : > { %315 = vst [vmem:[%s259_s20 + $0x28] sm:$0xff] %v314_v5 }
  0x19   : > { %317 = vst [vmem:[%s259_s20 + $0x30] sm:$0xff] %v316_v6 }
  0x1a   : > { %319 = vst [vmem:[%s259_s20 + $0x38] sm:$0xff] %v318_v7 }
  0x1b PF: > { %p1734_p7 = scmp.ge.s32.totalorder %s2057_s29, 1  ;;  %p324_p8 = scmp.lt.s32.totalorder %s2057_s29, 3 }
  0x1d   : > { %p325_p9 = pnand %p1734_p7, %p324_p8 }
  0x1e   : > { %s331_s14 = sand.u32 (!%p325_p9), 1, %s2049_s27   ;;  %s2060_s27 = smov (!%p325_p9), 64  }
  0x1f   : > { %328 = sbr.rel (%p325_p9) target bundleno = 3688 (0xe68), region = 86  ;;  %s2166_s17 = sshll.u32 (!%p325_p9), %s331_s14, 6 }
  0x20   : > { %s2180_s23 = scalar_lea.vmem (!%p325_p9), [#allocation4], %s2166_s17  ;;  %s2061_s16 = smov (!%p325_p9), 16  }
  0x21   : > { %s2062_s20 = smov (!%p325_p9), 112   ;;  %s2656_s26 = scalar_lea.vmem (!%p325_p9), [#allocation5], %s2166_s17 }
  0x24   : > { %v1739_v8 = vld [vmem:[%s2707_s1] sm:$0xf]  ;;  %v1868_v9 = vld [vmem:[%s2707_s1 + $0x4] sm:$0xf0]  ;;  %v1867_v10 = vld [vmem:[%s2707_s1 + $0x4] sm:$0xf]  ;;  %v489_v54 = vlaneseq }
  0x25   : > { %v1740_v11 = vor.u32 %v1868_v9, %v1739_v8  ;;  %v1741_v12 = vld [vmem:[%s2707_s1 + $0x8] sm:$0xf0]  ;;  %v1779_v13 = vld [vmem:[%s2708_s2 + $0x30] sm:$0xf]  ;;  %v1876_v15 = vld [vmem:[%s2708_s2 + $0x34] sm:$0xf0] }
  0x26   : > { %v1744_v14 = vor.u32 %v1867_v10, %v1741_v12  ;;  %v1771_v16 = vld [vmem:[%s2708_s2 + $0x20] sm:$0xf]  ;;  %v2174_v17 = vor.u32 %v1876_v15, %v1779_v13  ;;  %v1874_v18 = vld [vmem:[%s2708_s2 + $0x24] sm:$0xf0]  ;;  %vm394_vm0 = vcmask 130048   ;;  %v366_v43 = vld [vmem:[%s2180_s23 + $0x10] sm:$0xff] }
  0x27   : > { %414 = vmatpush.bf16.msra.mxu0 %v1740_v11  ;;  %1887 = vmatpush.bf16.msra.mxu2 %v1740_v11  ;;  %v364_v19 = vld [vmem:[%s2180_s23] sm:$0xff]  ;;  %v365_v20 = vld [vmem:[%s2180_s23 + $0x8] sm:$0xff]  ;;  %v2187_v24 = vor.u32 %v1874_v18, %v1771_v16  ;;  %v1763_v26 = vld [vmem:[%s2708_s2 + $0x10] sm:$0xf]  ;;  %v2059_v50 = vmov 0   ;;  %v490_v57 = vand.u32 127, %v489_v54 }
  0x28   : > { %1888 = vmatpush.bf16.msra.mxu3 %v1744_v14  ;;  %v368_v21 = vld [vmem:[%s2180_s23 + $0x20] sm:$0xff]  ;;  %443 = vmatpush.bf16.msra.mxu1 %v1744_v14  ;;  %v372_v22 = vpack.c.bf16 %v365_v20, %v364_v19  ;;  %v369_v23 = vld [vmem:[%s2180_s23 + $0x28] sm:$0xff]  ;;  %v1872_v27 = vld [vmem:[%s2708_s2 + $0x14] sm:$0xf0]  ;;  %vm569_vm11 = vcmask 523264   ;;  %s1864_s17 = sshll.u32 (%p2138_p5), %s1728_s30, 3 }
  0x29   : > { %v374_v25 = vpack.c.bf16 %v369_v23, %v368_v21  ;;  %v1875_v28 = vld [vmem:[%s2708_s2 + $0x34] sm:$0xf]  ;;  %v1781_v29 = vld [vmem:[%s2708_s2 + $0x38] sm:$0xf0]  ;;  %v1873_v30 = vld [vmem:[%s2708_s2 + $0x24] sm:$0xf]  ;;  %v2215_v33 = vor.u32 %v1872_v27, %v1763_v26  ;;  %s1610_s14 = scalar_lea.vmem (%p2138_p5), %s2714_s8, %s1864_s17 }
  0x2a   : > { %1745 = vmatmul.msk.bf16.vlgmr.msra.gmra.mxu0 %vm394_vm0, %v372_v22  ;;  %v2209_v31 = vor.u32 %v1875_v28, %v1781_v29  ;;  %v1773_v32 = vld [vmem:[%s2708_s2 + $0x28] sm:$0xf0]  ;;  %v1755_v35 = vld [vmem:[%s2708_s2] sm:$0xf]  ;;  %v1870_v36 = vld [vmem:[%s2708_s2 + $0x4] sm:$0xf0] }
  0x2b   : > { %577 = vmatpush.bf16.msrb.mxu2 %v2174_v17  ;;  %968 = vmatpush.bf16.msrb.mxu0 %v2174_v17  ;;  %v2219_v34 = vor.u32 %v1873_v30, %v1773_v32  ;;  %v1871_v37 = vld [vmem:[%s2708_s2 + $0x14] sm:$0xf]  ;;  %v1765_v38 = vld [vmem:[%s2708_s2 + $0x18] sm:$0xf0]  ;;  %v2235_v39 = vor.u32 %v1870_v36, %v1755_v35  ;;  %v1869_v41 = vld [vmem:[%s2708_s2 + $0x4] sm:$0xf] }
  0x2c   : > { %1749 = vmatmul.msk.bf16.vlgmr.msra.gmra.mxu1 %vm394_vm0, %v372_v22  ;;  %1747 = vmatmul.msk.bf16.vlgmr.msra.gmra.mxu2 %vm394_vm0, %v374_v25  ;;  %v2239_v40 = vor.u32 %v1871_v37, %v1765_v38  ;;  %v1757_v42 = vld [vmem:[%s2708_s2 + $0x8] sm:$0xf0]  ;;  %v367_v44 = vld [vmem:[%s2180_s23 + $0x18] sm:$0xff]  ;;  %v370_v45 = vld [vmem:[%s2180_s23 + $0x30] sm:$0xff]  ;;  %v491_v0 = vadd.s32 128, %v490_v57  ;;  %v496_v1 = vand.u32 63, %v490_v57 }
  0x2d   : > { %1751 = vmatmul.msk.bf16.vlgmr.msra.gmra.mxu3 %vm394_vm0, %v374_v25  ;;  %981 = vmatpush.bf16.msrb.mxu1 %v2209_v31  ;;  %v371_v46 = vld [vmem:[%s2180_s23 + $0x38] sm:$0xff]  ;;  %v2255_v47 = vor.u32 %v1869_v41, %v1757_v42  ;;  %v373_v48 = vpack.c.bf16 %v367_v44, %v366_v43  ;;  %v378_v53 = vld [vmem:[%s2709_s3] sm:$0x3] }
  0x2e   : > { %590 = vmatpush.bf16.msrb.mxu3 %v2209_v31  ;;  %v375_v49 = vpack.c.bf16 %v371_v46, %v370_v45  ;;  %v380_v55 = vperm.slane %v378_v53, 0  ;;  %v381_v56 = vperm.slane %v378_v53, 1  ;;  %v503_v2 = vand.u32 63, %v491_v0 }
  0x2f   : > { %578 = vmatpush.bf16.msrb.mxu2 %v2187_v24  ;;  %969 = vmatpush.bf16.msrb.mxu0 %v2187_v24  ;;  %vm2299_vm1 = vcmp.lt.s32.totalorder %v496_v1, 32 }
  0x30   : > { %vm2303_vm2 = vcmp.lt.s32.totalorder %v503_v2, 32 }
  0x31   : > { %982 = vmatpush.bf16.msrb.mxu1 %v2219_v34 }
  0x32   : > { %591 = vmatpush.bf16.msrb.mxu3 %v2219_v34 }
  0x33   : > { %579 = vmatpush.bf16.msrb.mxu2 %v2215_v33  ;;  %970 = vmatpush.bf16.msrb.mxu0 %v2215_v33 }
  0x35   : > { %983 = vmatpush.bf16.msrb.mxu1 %v2239_v40 }
  0x36   : > { %592 = vmatpush.bf16.msrb.mxu3 %v2239_v40 }
  0x37   : > { %580 = vmatpush.bf16.msrb.mxu2 %v2235_v39  ;;  %971 = vmatpush.bf16.msrb.mxu0 %v2235_v39 }
  0x39   : > { %984 = vmatpush.bf16.msrb.mxu1 %v2255_v47 }
  0x3a   : > { %593 = vmatpush.bf16.msrb.mxu3 %v2255_v47  ;;  %1746 = vmatmul.msk.bf16.gmra.mxu0 %vm394_vm0, %v373_v48 }
  0x3b   : > { %676 = vmatpush.bf16.msra.mxu2 %v2174_v17  ;;  %1156 = vmatpush.bf16.msra.mxu0 %v2174_v17 }
  0x3c   : > { %1750 = vmatmul.msk.bf16.gmra.mxu1 %vm394_vm0, %v373_v48  ;;  %1748 = vmatmul.msk.bf16.gmra.mxu2 %vm394_vm0, %v375_v49 }
  0x3d   : > { %1752 = vmatmul.msk.bf16.gmra.mxu3 %vm394_vm0, %v375_v49  ;;  %1169 = vmatpush.bf16.msra.mxu1 %v2209_v31 }
  0x3e   : > { %689 = vmatpush.bf16.msra.mxu3 %v2209_v31 }
  0x3f   : > { %677 = vmatpush.bf16.msra.mxu2 %v2187_v24  ;;  %1157 = vmatpush.bf16.msra.mxu0 %v2187_v24 }
  0x41   : > { %1170 = vmatpush.bf16.msra.mxu1 %v2219_v34 }
  0x42   : > { %690 = vmatpush.bf16.msra.mxu3 %v2219_v34 }
  0x43   : > { %678 = vmatpush.bf16.msra.mxu2 %v2215_v33  ;;  %1158 = vmatpush.bf16.msra.mxu0 %v2215_v33 }
  0x45   : > { %1171 = vmatpush.bf16.msra.mxu1 %v2239_v40 }
  0x46   : > { %691 = vmatpush.bf16.msra.mxu3 %v2239_v40 }
  0x47   : > { %679 = vmatpush.bf16.msra.mxu2 %v2235_v39  ;;  %1159 = vmatpush.bf16.msra.mxu0 %v2235_v39 }
  0x49   : > { %1172 = vmatpush.bf16.msra.mxu1 %v2255_v47 }
  0x4a   : > { %692 = vmatpush.bf16.msra.mxu3 %v2255_v47 }
  0x4c   : > { %581 = vmatmul.bf16.vlgmr.msrb.gmra.mxu2 %v2059_v50 }
  0x4d   : > { %594 = vmatmul.bf16.vlgmr.msrb.gmra.mxu3 %v2059_v50  ;;  %774 = vmatpush.bf16.msrb.mxu2 %v2174_v17 }
  0x4e   : > { %787 = vmatpush.bf16.msrb.mxu3 %v2209_v31 }
  0x51   : > { %775 = vmatpush.bf16.msrb.mxu2 %v2187_v24 }
  0x52   : > { %788 = vmatpush.bf16.msrb.mxu3 %v2219_v34 }
  0x55   : > { %776 = vmatpush.bf16.msrb.mxu2 %v2215_v33 }
  0x56   : > { %789 = vmatpush.bf16.msrb.mxu3 %v2239_v40 }
  0x59   : > { %777 = vmatpush.bf16.msrb.mxu2 %v2235_v39 }
  0x5a   : > { %790 = vmatpush.bf16.msrb.mxu3 %v2255_v47 }
  0xa7   : > { %v416_v51 = vpop.f32.mrf.mxu0 }
  0xa8   : > { %v2371_v42 = vadd.f32 %v416_v51, %v380_v55 }
  0xa9   : > { %v445_v52 = vpop.f32.mrf.mxu1 }
  0xaa   : > { %v2373_v45 = vadd.f32 %v445_v52, %v381_v56 }
  0xaf   : > { %v426_v58 = vpop.f32.mrf.mxu2  ;;  %v418_v62 = vpop.f32.mrf.mxu0 }
  0xb0   : > { %v455_v59 = vpop.f32.mrf.mxu3  ;;  %v2291_v60 = vadd.f32 %v426_v58, %v380_v55  ;;  %v2327_v18 = vadd.f32 %v418_v62, %v380_v55 }
  0xb1   : > { %v2293_v61 = vadd.f32 %v455_v59, %v381_v56  ;;  %v447_v63 = vpop.f32.mrf.mxu1 }
  0xb2   : > { %v2329_v19 = vadd.f32 %v447_v63, %v381_v56 }
  0xb7   : > { %v428_v3 = vpop.f32.mrf.mxu2  ;;  %v421_v7 = vpop.f32.mrf.mxu0 }
  0xb8   : > { %v457_v4 = vpop.f32.mrf.mxu3  ;;  %v2295_v5 = vadd.f32 %v428_v3, %v380_v55  ;;  %v2307_v11 = vadd.f32 %v421_v7, %v380_v55 }
  0xb9   : > { %v2297_v6 = vadd.f32 %v457_v4, %v381_v56  ;;  %v450_v8 = vpop.f32.mrf.mxu1 }
  0xba   : > { %v2309_v12 = vadd.f32 %v450_v8, %v381_v56  ;;  %v761_v13 = vsel %vm2299_vm1, %v2307_v11, %v2295_v5  ;;  %v1049_v15 = vsel %vm2299_vm1, %v2295_v5, %v2307_v11 }
  0xbc   : > { %v762_v14 = vsel %vm2303_vm2, %v2309_v12, %v2297_v6  ;;  %v1050_v16 = vsel %vm2303_vm2, %v2297_v6, %v2309_v12 }
  0xbf   : > { %v431_v20 = vpop.f32.mrf.mxu2  ;;  %v423_v25 = vpop.f32.mrf.mxu0 }
  0xc0   : > { %v460_v21 = vpop.f32.mrf.mxu3  ;;  %v2331_v22 = vadd.f32 %v431_v20, %v380_v55  ;;  %v2335_v27 = vadd.f32 %v423_v25, %v380_v55 }
  0xc1   : > { %v2333_v23 = vadd.f32 %v460_v21, %v381_v56  ;;  %v452_v26 = vpop.f32.mrf.mxu1 }
  0xc2   : > { %v2337_v28 = vadd.f32 %v452_v26, %v381_v56  ;;  %v663_v29 = vsel %vm2299_vm1, %v2327_v18, %v2331_v22  ;;  %v1143_v32 = vsel %vm2299_vm1, %v2331_v22, %v2327_v18  ;;  %v859_v36 = vsel %vm2299_vm1, %v2335_v27, %v2291_v60 }
  0xc3   : > { %v664_v30 = vsel %vm2303_vm2, %v2329_v19, %v2333_v23  ;;  %v1144_v35 = vsel %vm2303_vm2, %v2333_v23, %v2329_v19  ;;  %v955_v38 = vsel %vm2299_vm1, %v2291_v60, %v2335_v27 }
  0xc4   : > { %v860_v37 = vsel %vm2303_vm2, %v2337_v28, %v2293_v61  ;;  %v956_v41 = vsel %vm2303_vm2, %v2293_v61, %v2337_v28 }
  0xc7   : > { %v433_v43 = vpop.f32.mrf.mxu2 }
  0xc8   : > { %v462_v44 = vpop.f32.mrf.mxu3  ;;  %v2375_v46 = vadd.f32 %v433_v43, %v380_v55 }
  0xc9   : > { %v2377_v48 = vadd.f32 %v462_v44, %v381_v56 }
  0xca   : > { %v1237_v49 = vsel %vm2299_vm1, %v2375_v46, %v2371_v42  ;;  %v527_v51 = vsel %vm2299_vm1, %v2371_v42, %v2375_v46 }
  0xcb   : > { %v1238_v50 = vsel %vm2303_vm2, %v2377_v48, %v2373_v45  ;;  %v528_v62 = vsel %vm2303_vm2, %v2373_v45, %v2377_v48 }
  0xcf   : > { %v582_v52 = vpop.f32.mrf.mxu2 }
  0xd0   : > { %v595_v53 = vpop.f32.mrf.mxu3  ;;  %v583_v54 = vadd.f32 %v582_v52, %v527_v51 }
  0xd1   : > { %v596_v1 = vadd.f32 %v595_v53, %v528_v62 }
  0xd2   : > { %v1785_v55 = vmul.f32 -1.442695, %v583_v54 }
  0xd3   : > { %v1786_v44 = vmul.f32 -1.442695, %v596_v1 }
  0xd4   : > { %1939 = vpow2.f32 %v1785_v55 }
  0xd7   : > { %v584_v56 = vpop.f32.mrf.mxu2 }
  0xd8   : > { %v597_v57 = vpop.f32.mrf.mxu3 }
  0xda   : > { %v1940_v58 = vpop.eup %1939 }
  0xdb   : > { %v602_v59 = vadd.f32 1.0, %v1940_v58 }
  0xdd   : > { %1941 = vrcp.f32 %v602_v59  ;;  %v614_v3 = vand.u32 2147483648, %v602_v59  ;;  %v612_v7 = vand.u32 2147483647, %v602_v59  ;;  %vm608_vm4 = vweird.f32 %v602_v59 }
  0xde   : > { %1943 = vtanh.f32 %v596_v1 }
  0xdf   : > { %v615_v20 = vor.u32 1.1754944e-38, %v614_v3  ;;  %vm613_vm6 = vcmp.eq.f32.partialorder %v612_v7, 8.507059e+37  ;;  %1945 = vpow2.f32 %v1786_v44 }
  0xe3   : > { %v1942_v63 = vpop.eup %1941 }
  0xe4   : > { %v604_v0 = vmul.f32 %v1942_v63, %v602_v59  ;;  %vm609_vm3 = vweird.f32 %v1942_v63  ;;  %v1944_v25 = vpop.eup %1943 }
  0xe5   : > { %vm610_vm5 = vmor %vm608_vm4, %vm609_vm3  ;;  %v1946_v51 = vpop.eup %1945 }
  0xe6   : > { %v605_v2 = vsub.f32 1.0, %v604_v0  ;;  %v622_v52 = vadd.f32 1.0, %v1946_v51 }
  0xe8   : > { %v606_v4 = vmul.f32 %v1942_v63, %v605_v2  ;;  %1947 = vrcp.f32 %v622_v52  ;;  %vm628_vm7 = vweird.f32 %v622_v52  ;;  %v632_v0 = vand.u32 2147483647, %v622_v52 }
  0xea   : > { %v607_v8 = vadd.f32 %v1942_v63, %v606_v4  ;;  %vm633_vm10 = vcmp.eq.f32.partialorder %v632_v0, 8.507059e+37 }
  0xec   : > { %v611_v21 = vsel %vm610_vm5, %v1942_v63, %v607_v8  ;;  %v634_v63 = vand.u32 2147483648, %v622_v52 }
  0xed   : > { %v616_v26 = vsel %vm613_vm6, %v615_v20, %v611_v21 }
  0xee   : > { %v639_v43 = vmul.f32 %v1944_v25, %v616_v26  ;;  %v1948_v53 = vpop.eup %1947  ;;  %v638_v57 = vmul.f32 0.0, %v616_v26  ;;  %v635_v2 = vor.u32 1.1754944e-38, %v634_v63 }
  0xef   : > { %v624_v54 = vmul.f32 %v1948_v53, %v622_v52  ;;  %vm629_vm8 = vweird.f32 %v1948_v53 }
  0xf0   : > { %641 = vrot.lane.b32.xlu0 %v639_v43, %s2060_s27  ;;  %vm630_vm9 = vmor %vm628_vm7, %vm629_vm8 }
  0xf1   : > { %v625_v55 = vsub.f32 1.0, %v624_v54 }
  0xf3   : > { %v626_v56 = vmul.f32 %v1948_v53, %v625_v55 }
  0xf5   : > { %v627_v62 = vadd.f32 %v1948_v53, %v626_v56 }
  0xf7   : > { %v631_v1 = vsel %vm630_vm9, %v1948_v53, %v627_v62 }
  0xf8   : > { %v636_v4 = vsel %vm633_vm10, %v635_v2, %v631_v1 }
 0x162   : > { %v642_v58 = vpop.permute.xlu0 %641 }
 0x163   : > { %v2396_v59 = vadd.f32 %v642_v58, %v638_v57 }
 0x165   : > { %1949 = vtanh.f32 %v2396_v59 }
 0x16b   : > { %v1950_v3 = vpop.eup %1949 }
 0x16c   : > { %v646_v7 = vmul.f32 %v1950_v3, %v636_v4 }
 0x16e   : > { %v2399_v8 = vpack.c.bf16 %v646_v7, %v646_v7 }
 0x170   : > { %v665_v20 = vunpack.c.l.b16 %v2399_v8 }
 0x172   : > { %v666_v21 = vpack.c.b16 %v665_v20, %v665_v20 }
 0x174   : > { %667 = vrot.lane.b32.xlu0 %v666_v21, %s2060_s27 }
 0x1e6   : > { %v668_v25 = vpop.permute.xlu0 %667 }
 0x1e7   : > { %1787 = vmatmul.msk.bf16.vlgmr.msra.gmra.mxu2 %vm569_vm11, %v668_v25  ;;  %1788 = vmatmul.msk.bf16.vlgmr.msra.gmra.mxu3 %vm569_vm11, %v668_v25 }
 0x1e8   : > { %872 = vmatpush.bf16.msra.mxu2 %v2174_v17  ;;  %885 = vmatpush.bf16.msra.mxu3 %v2209_v31 }
 0x1ec   : > { %873 = vmatpush.bf16.msra.mxu2 %v2187_v24  ;;  %886 = vmatpush.bf16.msra.mxu3 %v2219_v34 }
 0x1f0   : > { %874 = vmatpush.bf16.msra.mxu2 %v2215_v33  ;;  %887 = vmatpush.bf16.msra.mxu3 %v2239_v40 }
 0x1f4   : > { %875 = vmatpush.bf16.msra.mxu2 %v2235_v39  ;;  %888 = vmatpush.bf16.msra.mxu3 %v2255_v47 }
 0x26a   : > { %v681_v26 = vpop.f32.mrf.mxu2  ;;  %v694_v43 = vpop.f32.mrf.mxu3 }
 0x26b   : > { %v682_v44 = vadd.f32 %v681_v26, %v663_v29  ;;  %v695_v57 = vadd.f32 %v694_v43, %v664_v30 }
 0x26d   : > { %v1789_v51 = vmul.f32 -1.442695, %v682_v44  ;;  %v1790_v21 = vmul.f32 -1.442695, %v695_v57 }
 0x26f   : > { %1951 = vpow2.f32 %v1789_v51 }
 0x272   : > { %v683_v52 = vpop.f32.mrf.mxu2  ;;  %v696_v53 = vpop.f32.mrf.mxu3 }
 0x275   : > { %v1952_v54 = vpop.eup %1951 }
 0x276   : > { %v701_v55 = vadd.f32 1.0, %v1952_v54 }
 0x278   : > { %1953 = vrcp.f32 %v701_v55  ;;  %v713_v63 = vand.u32 2147483648, %v701_v55  ;;  %v711_v29 = vand.u32 2147483647, %v701_v55  ;;  %vm707_vm13 = vweird.f32 %v701_v55 }
 0x279   : > { %1955 = vtanh.f32 %v695_v57 }
 0x27a   : > { %v714_v2 = vor.u32 1.1754944e-38, %v713_v63  ;;  %vm712_vm15 = vcmp.eq.f32.partialorder %v711_v29, 8.507059e+37  ;;  %1957 = vpow2.f32 %v1790_v21 }
 0x27e   : > { %v1954_v56 = vpop.eup %1953 }
 0x27f   : > { %v703_v58 = vmul.f32 %v1954_v56, %v701_v55  ;;  %vm708_vm12 = vweird.f32 %v1954_v56  ;;  %v1956_v4 = vpop.eup %1955 }
 0x280   : > { %vm709_vm14 = vmor %vm707_vm13, %vm708_vm12  ;;  %v1958_v30 = vpop.eup %1957 }
 0x281   : > { %v704_v62 = vsub.f32 1.0, %v703_v58  ;;  %v721_v25 = vadd.f32 1.0, %v1958_v30 }
 0x283   : > { %v705_v0 = vmul.f32 %v1954_v56, %v704_v62  ;;  %1959 = vrcp.f32 %v721_v25  ;;  %vm727_vm4 = vweird.f32 %v721_v25  ;;  %v731_v57 = vand.u32 2147483647, %v721_v25 }
 0x285   : > { %v706_v1 = vadd.f32 %v1954_v56, %v705_v0  ;;  %vm732_vm6 = vcmp.eq.f32.partialorder %v731_v57, 8.507059e+37 }
 0x287   : > { %v710_v3 = vsel %vm709_vm14, %v1954_v56, %v706_v1  ;;  %v733_v56 = vand.u32 2147483648, %v721_v25 }
 0x288   : > { %v715_v7 = vsel %vm712_vm15, %v714_v2, %v710_v3 }
 0x289   : > { %v738_v20 = vmul.f32 %v1956_v4, %v715_v7  ;;  %v1960_v26 = vpop.eup %1959  ;;  %v737_v52 = vmul.f32 %v715_v7, %v2396_v59  ;;  %v734_v62 = vor.u32 1.1754944e-38, %v733_v56 }
 0x28a   : > { %v723_v43 = vmul.f32 %v1960_v26, %v721_v25  ;;  %vm728_vm3 = vweird.f32 %v1960_v26 }
 0x28b   : > { %740 = vrot.lane.b32.xlu1 %v738_v20, %s2060_s27  ;;  %vm729_vm5 = vmor %vm727_vm4, %vm728_vm3 }
 0x28c   : > { %v724_v44 = vsub.f32 1.0, %v723_v43 }
 0x28e   : > { %v725_v51 = vmul.f32 %v1960_v26, %v724_v44 }
 0x290   : > { %v726_v55 = vadd.f32 %v1960_v26, %v725_v51 }
 0x292   : > { %v730_v58 = vsel %vm729_vm5, %v1960_v26, %v726_v55 }
 0x293   : > { %v735_v0 = vsel %vm732_vm6, %v734_v62, %v730_v58 }
 0x2fd   : > { %v741_v53 = vpop.permute.xlu1 %740 }
 0x2fe   : > { %v2425_v54 = vadd.f32 %v741_v53, %v737_v52 }
 0x300   : > { %1961 = vtanh.f32 %v2425_v54 }
 0x306   : > { %v1962_v63 = vpop.eup %1961 }
 0x307   : > { %v745_v29 = vmul.f32 %v1962_v63, %v735_v0 }
 0x309   : > { %v2428_v1 = vpack.c.bf16 %v745_v29, %v745_v29 }
 0x30b   : > { %v763_v59 = vunpack.c.l.b16 %v2428_v1 }
 0x30d   : > { %v764_v2 = vpack.c.b16 %v763_v59, %v763_v59 }
 0x30f   : > { %765 = vrot.lane.b32.xlu1 %v764_v2, %s2060_s27 }
 0x381   : > { %v766_v3 = vpop.permute.xlu1 %765 }
 0x382   : > { %1791 = vmatmul.msk.bf16.vlgmr.msrb.gmra.mxu2 %vm569_vm11, %v766_v3  ;;  %1792 = vmatmul.msk.bf16.vlgmr.msrb.gmra.mxu3 %vm569_vm11, %v766_v3 }
 0x383   : > { %1062 = vmatpush.bf16.msrb.mxu2 %v2174_v17  ;;  %1075 = vmatpush.bf16.msrb.mxu3 %v2209_v31 }
 0x387   : > { %1063 = vmatpush.bf16.msrb.mxu2 %v2187_v24  ;;  %1076 = vmatpush.bf16.msrb.mxu3 %v2219_v34 }
 0x38b   : > { %1064 = vmatpush.bf16.msrb.mxu2 %v2215_v33  ;;  %1077 = vmatpush.bf16.msrb.mxu3 %v2239_v40 }
 0x38f   : > { %1065 = vmatpush.bf16.msrb.mxu2 %v2235_v39  ;;  %1078 = vmatpush.bf16.msrb.mxu3 %v2255_v47 }
 0x405   : > { %v779_v4 = vpop.f32.mrf.mxu2  ;;  %v792_v7 = vpop.f32.mrf.mxu3 }
 0x406   : > { %v780_v20 = vadd.f32 %v779_v4, %v761_v13  ;;  %v793_v51 = vadd.f32 %v792_v7, %v762_v14 }
 0x408   : > { %v1793_v21 = vmul.f32 -1.442695, %v780_v20  ;;  %v1794_v59 = vmul.f32 -1.442695, %v793_v51 }
 0x40a   : > { %1963 = vpow2.f32 %v1793_v21 }
 0x40d   : > { %v781_v30 = vpop.f32.mrf.mxu2  ;;  %v794_v25 = vpop.f32.mrf.mxu3 }
 0x410   : > { %v1964_v26 = vpop.eup %1963 }
 0x411   : > { %v799_v43 = vadd.f32 1.0, %v1964_v26 }
 0x413   : > { %1965 = vrcp.f32 %v799_v43  ;;  %v811_v55 = vand.u32 2147483648, %v799_v43  ;;  %v809_v13 = vand.u32 2147483647, %v799_v43  ;;  %vm805_vm8 = vweird.f32 %v799_v43 }
 0x414   : > { %1967 = vtanh.f32 %v793_v51 }
 0x415   : > { %v812_v58 = vor.u32 1.1754944e-38, %v811_v55  ;;  %vm810_vm10 = vcmp.eq.f32.partialorder %v809_v13, 8.507059e+37  ;;  %1969 = vpow2.f32 %v1794_v59 }
 0x419   : > { %v1966_v44 = vpop.eup %1965 }
 0x41a   : > { %v801_v52 = vmul.f32 %v1966_v44, %v799_v43  ;;  %vm806_vm7 = vweird.f32 %v1966_v44  ;;  %v1968_v63 = vpop.eup %1967 }
 0x41b   : > { %vm807_vm9 = vmor %vm805_vm8, %vm806_vm7  ;;  %v1970_v14 = vpop.eup %1969 }
 0x41c   : > { %v802_v53 = vsub.f32 1.0, %v801_v52  ;;  %v819_v2 = vadd.f32 1.0, %v1970_v14 }
 0x41e   : > { %v803_v56 = vmul.f32 %v1966_v44, %v802_v53  ;;  %1971 = vrcp.f32 %v819_v2  ;;  %v831_v43 = vand.u32 2147483648, %v819_v2  ;;  %vm825_vm13 = vweird.f32 %v819_v2 }
 0x420   : > { %v804_v57 = vadd.f32 %v1966_v44, %v803_v56  ;;  %v832_v52 = vor.u32 1.1754944e-38, %v831_v43 }
 0x422   : > { %v808_v62 = vsel %vm807_vm9, %v1966_v44, %v804_v57  ;;  %v829_v44 = vand.u32 2147483647, %v819_v2 }
 0x423   : > { %v813_v0 = vsel %vm810_vm10, %v812_v58, %v808_v62 }
 0x424   : > { %v836_v29 = vmul.f32 %v1968_v63, %v813_v0  ;;  %v1972_v3 = vpop.eup %1971  ;;  %v835_v21 = vmul.f32 %v813_v0, %v2425_v54  ;;  %vm830_vm15 = vcmp.eq.f32.partialorder %v829_v44, 8.507059e+37 }
 0x425   : > { %v821_v4 = vmul.f32 %v1972_v3, %v819_v2  ;;  %vm826_vm12 = vweird.f32 %v1972_v3 }
 0x426   : > { %838 = vrot.lane.b32.xlu2 %v836_v29, %s2060_s27  ;;  %vm827_vm14 = vmor %vm825_vm13, %vm826_vm12 }
 0x427   : > { %v822_v7 = vsub.f32 1.0, %v821_v4 }
 0x429   : > { %v823_v20 = vmul.f32 %v1972_v3, %v822_v7 }
 0x42b   : > { %v824_v26 = vadd.f32 %v1972_v3, %v823_v20 }
 0x42d   : > { %v828_v51 = vsel %vm827_vm14, %v1972_v3, %v824_v26 }
 0x42e   : > { %v833_v55 = vsel %vm830_vm15, %v832_v52, %v828_v51 }
 0x480   : > { %v839_v30 = vpop.permute.xlu2 %838 }
 0x481   : > { %v2454_v25 = vadd.f32 %v839_v30, %v835_v21 }
 0x483   : > { %1973 = vtanh.f32 %v2454_v25 }
 0x489   : > { %v1974_v53 = vpop.eup %1973 }
 0x48a   : > { %v843_v56 = vmul.f32 %v1974_v53, %v833_v55 }
 0x48c   : > { %v2457_v13 = vpack.c.bf16 %v843_v56, %v843_v56 }
 0x48e   : > { %v861_v54 = vunpack.c.l.b16 %v2457_v13 }
 0x490   : > { %v862_v57 = vpack.c.b16 %v861_v54, %v861_v54 }
 0x492   : > { %863 = vrot.lane.b32.xlu2 %v862_v57, %s2060_s27 }
 0x4ec   : > { %v864_v58 = vpop.permute.xlu2 %863 }
 0x4ed   : > { %1795 = vmatmul.msk.bf16.vlgmr.msra.gmra.mxu2 %vm569_vm11, %v864_v58  ;;  %1796 = vmatmul.msk.bf16.vlgmr.msra.gmra.mxu3 %vm569_vm11, %v864_v58 }
 0x4ee   : > { %1250 = vmatpush.bf16.msra.mxu2 %v2174_v17  ;;  %1263 = vmatpush.bf16.msra.mxu3 %v2209_v31 }
 0x4f2   : > { %1251 = vmatpush.bf16.msra.mxu2 %v2187_v24  ;;  %1264 = vmatpush.bf16.msra.mxu3 %v2219_v34 }
 0x4f6   : > { %1252 = vmatpush.bf16.msra.mxu2 %v2215_v33  ;;  %1265 = vmatpush.bf16.msra.mxu3 %v2239_v40 }
 0x4fa   : > { %1253 = vmatpush.bf16.msra.mxu2 %v2235_v39  ;;  %1266 = vmatpush.bf16.msra.mxu3 %v2255_v47 }
 0x570   : > { %v877_v62 = vpop.f32.mrf.mxu2  ;;  %v890_v63 = vpop.f32.mrf.mxu3 }
 0x571   : > { %v878_v17 = vadd.f32 %v877_v62, %v859_v36  ;;  %v891_v39 = vadd.f32 %v890_v63, %v860_v37 }
 0x573   : > { %v1797_v31 = vmul.f32 -1.442695, %v878_v17  ;;  %v1798_v30 = vmul.f32 -1.442695, %v891_v39 }
 0x575   : > { %1975 = vpow2.f32 %v1797_v31 }
 0x578   : > { %v879_v24 = vpop.f32.mrf.mxu2  ;;  %v892_v34 = vpop.f32.mrf.mxu3 }
 0x57b   : > { %v1976_v0 = vpop.eup %1975 }
 0x57c   : > { %v897_v33 = vadd.f32 1.0, %v1976_v0 }
 0x57e   : > { %1977 = vrcp.f32 %v897_v33  ;;  %v909_v59 = vand.u32 2147483648, %v897_v33  ;;  %v907_v36 = vand.u32 2147483647, %v897_v33  ;;  %vm903_vm4 = vweird.f32 %v897_v33 }
 0x57f   : > { %1979 = vtanh.f32 %v891_v39 }
 0x580   : > { %v910_v3 = vor.u32 1.1754944e-38, %v909_v59  ;;  %vm908_vm6 = vcmp.eq.f32.partialorder %v907_v36, 8.507059e+37  ;;  %1981 = vpow2.f32 %v1798_v30 }
 0x584   : > { %v1978_v40 = vpop.eup %1977 }
 0x585   : > { %v899_v47 = vmul.f32 %v1978_v40, %v897_v33  ;;  %vm904_vm3 = vweird.f32 %v1978_v40  ;;  %v1980_v7 = vpop.eup %1979 }
 0x586   : > { %vm905_vm5 = vmor %vm903_vm4, %vm904_vm3  ;;  %v1982_v37 = vpop.eup %1981 }
 0x587   : > { %v900_v29 = vsub.f32 1.0, %v899_v47  ;;  %v917_v26 = vadd.f32 1.0, %v1982_v37 }
 0x589   : > { %v901_v14 = vmul.f32 %v1978_v40, %v900_v29  ;;  %1983 = vrcp.f32 %v917_v26  ;;  %v929_v57 = vand.u32 2147483648, %v917_v26  ;;  %vm923_vm8 = vweird.f32 %v917_v26 }
 0x58a   : > { %v927_v58 = vand.u32 2147483647, %v917_v26 }
 0x58b   : > { %v902_v2 = vadd.f32 %v1978_v40, %v901_v14  ;;  %v930_v63 = vor.u32 1.1754944e-38, %v929_v57 }
 0x58c   : > { %vm928_vm10 = vcmp.eq.f32.partialorder %v927_v58, 8.507059e+37 }
 0x58d   : > { %v906_v4 = vsel %vm905_vm5, %v1978_v40, %v902_v2 }
 0x58e   : > { %v911_v20 = vsel %vm908_vm6, %v910_v3, %v906_v4 }
 0x58f   : > { %v934_v21 = vmul.f32 %v1980_v7, %v911_v20  ;;  %v1984_v43 = vpop.eup %1983  ;;  %v933_v53 = vmul.f32 %v911_v20, %v2454_v25 }
 0x590   : > { %v919_v44 = vmul.f32 %v1984_v43, %v917_v26  ;;  %vm924_vm7 = vweird.f32 %v1984_v43 }
 0x591   : > { %936 = vrot.lane.b32.xlu0 %v934_v21, %s2060_s27  ;;  %vm925_vm9 = vmor %vm923_vm8, %vm924_vm7 }
 0x592   : > { %v920_v51 = vsub.f32 1.0, %v919_v44 }
 0x594   : > { %v921_v52 = vmul.f32 %v1984_v43, %v920_v51 }
 0x596   : > { %v922_v54 = vadd.f32 %v1984_v43, %v921_v52 }
 0x598   : > { %v926_v62 = vsel %vm925_vm9, %v1984_v43, %v922_v54 }
 0x599   : > { %v931_v31 = vsel %vm928_vm10, %v930_v63, %v926_v62 }
 0x603   : > { %v937_v55 = vpop.permute.xlu0 %936 }
 0x604   : > { %v939_v56 = vadd.f32 %v937_v55, %v933_v53 }
 0x606   : > { %1985 = vtanh.f32 %v939_v56 }
 0x60c   : > { %v1986_v17 = vpop.eup %1985 }
 0x60d   : > { %v941_v24 = vmul.f32 %v1986_v17, %v931_v31 }
 0x60f   : > { %v2483_v34 = vpack.c.bf16 %v941_v24, %v941_v24 }
 0x611   : > { %v957_v0 = vunpack.c.l.b16 %v2483_v34 }
 0x613   : > { %v958_v25 = vpack.c.b16 %v957_v0, %v957_v0 }
 0x615   : > { %959 = vrot.lane.b32.xlu1 %v958_v25, %s2060_s27 }
 0x687   : > { %v960_v33 = vpop.permute.xlu1 %959 }
 0x688   : > { %1799 = vmatmul.msk.bf16.vlgmr.msrb.gmra.mxu0 %vm569_vm11, %v960_v33  ;;  %1800 = vmatmul.msk.bf16.vlgmr.msrb.gmra.mxu1 %vm569_vm11, %v960_v33 }
 0x705   : > { %v973_v40 = vpop.f32.mrf.mxu0  ;;  %v986_v39 = vpop.f32.mrf.mxu1 }
 0x706   : > { %v974_v47 = vadd.f32 %v973_v40, %v955_v38  ;;  %v987_v4 = vadd.f32 %v986_v39, %v956_v41 }
 0x708   : > { %v1801_v29 = vmul.f32 -1.442695, %v974_v47  ;;  %v1802_v61 = vmul.f32 -1.442695, %v987_v4 }
 0x70a   : > { %1987 = vpow2.f32 %v1801_v29 }
 0x70d   : > { %v975_v59 = vpop.f32.mrf.mxu0  ;;  %v988_v14 = vpop.f32.mrf.mxu1 }
 0x710   : > { %v1988_v36 = vpop.eup %1987 }
 0x711   : > { %v993_v2 = vadd.f32 1.0, %v1988_v36 }
 0x713   : > { %1989 = vrcp.f32 %v993_v2  ;;  %v1005_v21 = vand.u32 2147483648, %v993_v2  ;;  %v1003_v27 = vand.u32 2147483647, %v993_v2  ;;  %vm999_vm13 = vweird.f32 %v993_v2 }
 0x714   : > { %1991 = vtanh.f32 %v987_v4 }
 0x715   : > { %v1006_v30 = vor.u32 1.1754944e-38, %v1005_v21  ;;  %vm1004_vm15 = vcmp.eq.f32.partialorder %v1003_v27, 8.507059e+37  ;;  %1993 = vpow2.f32 %v1802_v61 }
 0x719   : > { %v1990_v3 = vpop.eup %1989 }
 0x71a   : > { %v995_v7 = vmul.f32 %v1990_v3, %v993_v2  ;;  %vm1000_vm12 = vweird.f32 %v1990_v3  ;;  %v1992_v26 = vpop.eup %1991 }
 0x71b   : > { %vm1001_vm14 = vmor %vm999_vm13, %vm1000_vm12  ;;  %v1994_v28 = vpop.eup %1993 }
 0x71c   : > { %v996_v20 = vsub.f32 1.0, %v995_v7  ;;  %v1013_v41 = vadd.f32 1.0, %v1994_v28 }
 0x71e   : > { %v997_v60 = vmul.f32 %v1990_v3, %v996_v20  ;;  %1995 = vrcp.f32 %v1013_v41  ;;  %v1025_v63 = vand.u32 2147483648, %v1013_v41  ;;  %vm1019_vm4 = vweird.f32 %v1013_v41 }
 0x71f   : > { %v1023_v17 = vand.u32 2147483647, %v1013_v41 }
 0x720   : > { %v998_v38 = vadd.f32 %v1990_v3, %v997_v60  ;;  %v1026_v24 = vor.u32 1.1754944e-38, %v1025_v63 }
 0x721   : > { %vm1024_vm6 = vcmp.eq.f32.partialorder %v1023_v17, 8.507059e+37 }
 0x722   : > { %v1002_v37 = vsel %vm1001_vm14, %v1990_v3, %v998_v38 }
 0x723   : > { %v1007_v43 = vsel %vm1004_vm15, %v1006_v30, %v1002_v37 }
 0x724   : > { %v1030_v44 = vmul.f32 %v1992_v26, %v1007_v43  ;;  %v1996_v51 = vpop.eup %1995  ;;  %v1029_v54 = vmul.f32 %v1007_v43, %v939_v56 }
 0x725   : > { %v1015_v52 = vmul.f32 %v1996_v51, %v1013_v41  ;;  %vm1020_vm3 = vweird.f32 %v1996_v51 }
 0x726   : > { %1032 = vrot.lane.b32.xlu2 %v1030_v44, %s2060_s27  ;;  %vm1021_vm5 = vmor %vm1019_vm4, %vm1020_vm3 }
 0x727   : > { %v1016_v53 = vsub.f32 1.0, %v1015_v52 }
 0x729   : > { %v1017_v55 = vmul.f32 %v1996_v51, %v1016_v53 }
 0x72b   : > { %v1018_v62 = vadd.f32 %v1996_v51, %v1017_v55 }
 0x72d   : > { %v1022_v31 = vsel %vm1021_vm5, %v1996_v51, %v1018_v62 }
 0x72e   : > { %v1027_v25 = vsel %vm1024_vm6, %v1026_v24, %v1022_v31 }
 0x780   : > { %v1033_v57 = vpop.permute.xlu2 %1032 }
 0x781   : > { %v1035_v58 = vadd.f32 %v1033_v57, %v1029_v54 }
 0x783   : > { %1997 = vtanh.f32 %v1035_v58 }
 0x789   : > { %v1998_v0 = vpop.eup %1997 }
 0x78a   : > { %v1037_v33 = vmul.f32 %v1998_v0, %v1027_v25 }
 0x78c   : > { %v2500_v40 = vpack.c.bf16 %v1037_v33, %v1037_v33 }
 0x78e   : > { %v1051_v39 = vunpack.c.l.b16 %v2500_v40 }
 0x790   : > { %v1052_v56 = vpack.c.b16 %v1051_v39, %v1051_v39 }
 0x792   : > { %1053 = vrot.lane.b32.xlu0 %v1052_v56, %s2060_s27 }
 0x804   : > { %v1054_v47 = vpop.permute.xlu0 %1053 }
 0x805   : > { %1803 = vmatmul.msk.bf16.vlgmr.msrb.gmra.mxu2 %vm569_vm11, %v1054_v47  ;;  %1804 = vmatmul.msk.bf16.vlgmr.msrb.gmra.mxu3 %vm569_vm11, %v1054_v47 }
 0x888   : > { %v1067_v29 = vpop.f32.mrf.mxu2  ;;  %v1080_v59 = vpop.f32.mrf.mxu3 }
 0x889   : > { %v1068_v14 = vadd.f32 %v1067_v29, %v1049_v15  ;;  %v1081_v21 = vadd.f32 %v1080_v59, %v1050_v16 }
 0x88b   : > { %v1805_v36 = vmul.f32 -1.442695, %v1068_v14  ;;  %v1806_v6 = vmul.f32 -1.442695, %v1081_v21 }
 0x88d   : > { %1999 = vpow2.f32 %v1805_v36 }
 0x890   : > { %v1069_v2 = vpop.f32.mrf.mxu2  ;;  %v1082_v3 = vpop.f32.mrf.mxu3 }
 0x893   : > { %v2000_v4 = vpop.eup %1999 }
 0x894   : > { %v1087_v7 = vadd.f32 1.0, %v2000_v4 }
 0x896   : > { %2001 = vrcp.f32 %v1087_v7  ;;  %v1099_v38 = vand.u32 2147483648, %v1087_v7  ;;  %v1097_v11 = vand.u32 2147483647, %v1087_v7  ;;  %vm1093_vm8 = vweird.f32 %v1087_v7 }
 0x897   : > { %2003 = vtanh.f32 %v1081_v21 }
 0x898   : > { %v1100_v30 = vor.u32 1.1754944e-38, %v1099_v38  ;;  %vm1098_vm10 = vcmp.eq.f32.partialorder %v1097_v11, 8.507059e+37  ;;  %2005 = vpow2.f32 %v1806_v6 }
 0x89c   : > { %v2002_v20 = vpop.eup %2001 }
 0x89d   : > { %v1089_v60 = vmul.f32 %v2002_v20, %v1087_v7  ;;  %vm1094_vm7 = vweird.f32 %v2002_v20  ;;  %v2004_v26 = vpop.eup %2003 }
 0x89e   : > { %vm1095_vm9 = vmor %vm1093_vm8, %vm1094_vm7  ;;  %v2006_v12 = vpop.eup %2005 }
 0x89f   : > { %v1090_v27 = vsub.f32 1.0, %v1089_v60  ;;  %v1107_v16 = vadd.f32 1.0, %v2006_v12 }
 0x8a1   : > { %v1091_v5 = vmul.f32 %v2002_v20, %v1090_v27  ;;  %2007 = vrcp.f32 %v1107_v16  ;;  %v1119_v57 = vand.u32 2147483648, %v1107_v16  ;;  %vm1113_vm13 = vweird.f32 %v1107_v16 }
 0x8a2   : > { %v1117_v62 = vand.u32 2147483647, %v1107_v16 }
 0x8a3   : > { %v1092_v15 = vadd.f32 %v2002_v20, %v1091_v5  ;;  %v1120_v17 = vor.u32 1.1754944e-38, %v1119_v57 }
 0x8a4   : > { %vm1118_vm15 = vcmp.eq.f32.partialorder %v1117_v62, 8.507059e+37 }
 0x8a5   : > { %v1096_v37 = vsel %vm1095_vm9, %v2002_v20, %v1092_v15 }
 0x8a6   : > { %v1101_v43 = vsel %vm1098_vm10, %v1100_v30, %v1096_v37  ;;  %vm652_vm10 = vcmask 257024  }
 0x8a7   : > { %v1124_v44 = vmul.f32 %v2004_v26, %v1101_v43  ;;  %v2008_v61 = vpop.eup %2007  ;;  %v1123_v52 = vmul.f32 %v1101_v43, %v1035_v58 }
 0x8a8   : > { %v1109_v28 = vmul.f32 %v2008_v61, %v1107_v16  ;;  %vm1114_vm12 = vweird.f32 %v2008_v61 }
 0x8a9   : > { %1126 = vrot.lane.b32.xlu1 %v1124_v44, %s2060_s27  ;;  %vm1115_vm14 = vmor %vm1113_vm13, %vm1114_vm12  ;;  %vm655_vm12 = vcmask 519424  }
 0x8aa   : > { %v1110_v41 = vsub.f32 1.0, %v1109_v28 }
 0x8ac   : > { %v1111_v51 = vmul.f32 %v2008_v61, %v1110_v41 }
 0x8ae   : > { %v1112_v54 = vadd.f32 %v2008_v61, %v1111_v51 }
 0x8b0   : > { %v1116_v63 = vsel %vm1115_vm14, %v2008_v61, %v1112_v54 }
 0x8b1   : > { %v1121_v24 = vsel %vm1118_vm15, %v1120_v17, %v1116_v63 }
 0x91b   : > { %v1127_v53 = vpop.permute.xlu1 %1126 }
 0x91c   : > { %v1129_v55 = vadd.f32 %v1127_v53, %v1123_v52 }
 0x91e   : > { %2009 = vtanh.f32 %v1129_v55 }
 0x924   : > { %v2010_v31 = vpop.eup %2009 }
 0x925   : > { %v1131_v0 = vmul.f32 %v2010_v31, %v1121_v24 }
 0x927   : > { %v2517_v25 = vpack.c.bf16 %v1131_v0, %v1131_v0 }
 0x929   : > { %v1145_v33 = vunpack.c.l.b16 %v2517_v25 }
 0x92b   : > { %v1146_v58 = vpack.c.b16 %v1145_v33, %v1145_v33 }
 0x92d   : > { %1147 = vrot.lane.b32.xlu2 %v1146_v58, %s2060_s27 }
 0x987   : > { %v1148_v39 = vpop.permute.xlu2 %1147 }
 0x988   : > { %1807 = vmatmul.msk.bf16.vlgmr.msra.gmra.mxu0 %vm569_vm11, %v1148_v39  ;;  %1808 = vmatmul.msk.bf16.vlgmr.msra.gmra.mxu1 %vm569_vm11, %v1148_v39 }
 0xa05   : > { %v1161_v56 = vpop.f32.mrf.mxu0  ;;  %v1174_v47 = vpop.f32.mrf.mxu1 }
 0xa06   : > { %v1162_v29 = vadd.f32 %v1161_v56, %v1143_v32  ;;  %v1175_v7 = vadd.f32 %v1174_v47, %v1144_v35 }
 0xa08   : > { %v1809_v59 = vmul.f32 -1.442695, %v1162_v29  ;;  %v1810_v19 = vmul.f32 -1.442695, %v1175_v7 }
 0xa0a   : > { %2011 = vpow2.f32 %v1809_v59 }
 0xa0d   : > { %v1163_v14 = vpop.f32.mrf.mxu0  ;;  %v1176_v36 = vpop.f32.mrf.mxu1 }
 0xa10   : > { %v2012_v2 = vpop.eup %2011 }
 0xa11   : > { %v1181_v3 = vadd.f32 1.0, %v2012_v2 }
 0xa13   : > { %2013 = vrcp.f32 %v1181_v3  ;;  %v1193_v60 = vand.u32 2147483648, %v1181_v3  ;;  %v1191_v22 = vand.u32 2147483647, %v1181_v3  ;;  %vm1187_vm4 = vweird.f32 %v1181_v3 }
 0xa14   : > { %2015 = vtanh.f32 %v1175_v7 }
 0xa15   : > { %v1194_v27 = vor.u32 1.1754944e-38, %v1193_v60  ;;  %vm1192_vm6 = vcmp.eq.f32.partialorder %v1191_v22, 8.507059e+37  ;;  %2017 = vpow2.f32 %v1810_v19  ;;  %v1883_v60 = vld [vmem:[%s2710_s4 + $0x10] sm:$0xff] }
 0xa19   : > { %v2014_v4 = vpop.eup %2013 }
 0xa1a   : > { %v1183_v20 = vmul.f32 %v2014_v4, %v1181_v3  ;;  %vm1188_vm3 = vweird.f32 %v2014_v4  ;;  %v2016_v5 = vpop.eup %2015 }
 0xa1b   : > { %vm1189_vm5 = vmor %vm1187_vm4, %vm1188_vm3  ;;  %v2018_v23 = vpop.eup %2017 }
 0xa1c   : > { %v1184_v21 = vsub.f32 1.0, %v1183_v20  ;;  %v1201_v35 = vadd.f32 1.0, %v2018_v23 }
 0xa1e   : > { %v1185_v18 = vmul.f32 %v2014_v4, %v1184_v21  ;;  %2019 = vrcp.f32 %v1201_v35  ;;  %v1213_v61 = vand.u32 2147483648, %v1201_v35  ;;  %vm1207_vm8 = vweird.f32 %v1201_v35  ;;  %v1884_v21 = vld [vmem:[%s2710_s4 + $0x18] sm:$0xff] }
 0xa1f   : > { %1415 = vmatpush.bf16.msrb.mxu0 %v1884_v21 }
 0xa20   : > { %v1186_v32 = vadd.f32 %v2014_v4, %v1185_v18  ;;  %v1214_v41 = vor.u32 1.1754944e-38, %v1213_v61 }
 0xa22   : > { %v1190_v38 = vsel %vm1189_vm5, %v2014_v4, %v1186_v32 }
 0xa23   : > { %v1195_v11 = vsel %vm1192_vm6, %v1194_v27, %v1190_v38  ;;  %1416 = vmatpush.bf16.msrb.mxu0 %v1883_v60 }
 0xa24   : > { %v1218_v15 = vmul.f32 %v2016_v5, %v1195_v11  ;;  %v2020_v30 = vpop.eup %2019  ;;  %v1217_v44 = vmul.f32 %v1195_v11, %v1129_v55 }
 0xa25   : > { %v1203_v37 = vmul.f32 %v2020_v30, %v1201_v35  ;;  %vm1208_vm7 = vweird.f32 %v2020_v30 }
 0xa26   : > { %1220 = vrot.lane.b32.xlu0 %v1218_v15, %s2060_s27  ;;  %vm1209_vm9 = vmor %vm1207_vm8, %vm1208_vm7 }
 0xa27   : > { %v1204_v26 = vsub.f32 1.0, %v1203_v37 }
 0xa29   : > { %v1205_v43 = vmul.f32 %v2020_v30, %v1204_v26 }
 0xa2b   : > { %v1206_v16 = vadd.f32 %v2020_v30, %v1205_v43 }
 0xa2d   : > { %v1210_v28 = vsel %vm1209_vm9, %v2020_v30, %v1206_v16 }
 0xa2e   : > { %649 = vrot.lane.b32.xlu0 %v2399_v8, %s2060_s27  ;;  %v1211_v8 = vand.u32 2147483647, %v1201_v35 }
 0xa30   : > { %vm1212_vm13 = vcmp.eq.f32.partialorder %v1211_v8, 8.507059e+37  ;;  %v2597_v8 = vld [vmem:[%s2180_s23] sm:$0xff] }
 0xa31   : > { %v1215_v53 = vsel %vm1212_vm13, %v1214_v41, %v1210_v28  ;;  %v2600_v28 = vld [vmem:[%s2180_s23 + $0x8] sm:$0xff] }
 0xa32   : > { %v1917_v41 = vpack.i.bf16 %v2600_v28, %v2597_v8 }
 0xa98   : > { %v1221_v6 = vpop.permute.xlu0 %1220 }
 0xa99   : > { %v2536_v12 = vadd.f32 %v1221_v6, %v1217_v44  ;;  %v1882_v44 = vld [vmem:[%s2710_s4 + $0x8] sm:$0xff]  ;;  %v1881_v6 = vld [vmem:[%s2710_s4] sm:$0xff] }
 0xa9a   : > { %1417 = vmatpush.bf16.msrb.mxu0 %v1882_v44 }
 0xa9b   : > { %2021 = vtanh.f32 %v2536_v12 }
 0xa9e   : > { %1418 = vmatpush.bf16.msrb.mxu0 %v1881_v6 }
 0xaa0   : > { %v650_v51 = vpop.permute.xlu0 %649 }
 0xaa1   : > { %v2022_v52 = vpop.eup %2021  ;;  %653 = vst.msk [vmem:[#allocation3] sm:$0xf] %vm652_vm10, %v650_v51 }
 0xaa2   : > { %656 = vst.msk [vmem:[#allocation3 + $0x1c] sm:$0xf] %vm655_vm12, %v650_v51  ;;  %v1225_v55 = vmul.f32 %v2022_v52, %v1215_v53  ;;  %v2605_v51 = vld [vmem:[%s2180_s23 + $0x10] sm:$0xff]  ;;  %v2608_v52 = vld [vmem:[%s2180_s23 + $0x18] sm:$0xff] }
 0xaa3   : > { %v1922_v53 = vpack.i.bf16 %v2608_v52, %v2605_v51 }
 0xaa4   : > { %v1226_v54 = vpack.c.bf16 %v1225_v55, %v1225_v55 }
 0xaa6   : > { %v1239_v57 = vunpack.c.l.b16 %v1226_v54 }
 0xaa8   : > { %v1240_v62 = vpack.c.b16 %v1239_v57, %v1239_v57  ;;  %v2615_v57 = vld [vmem:[%s2180_s23 + $0x20] sm:$0xff] }
 0xaaa   : > { %1241 = vrot.lane.b32.xlu1 %v1240_v62, %s2060_s27  ;;  %v2618_v62 = vld [vmem:[%s2180_s23 + $0x28] sm:$0xff] }
 0xab2   : > { %748 = vrot.lane.b32.xlu1 %v2428_v1, %s2060_s27 }
 0xaba   : > { %846 = vrot.lane.b32.xlu1 %v2457_v13, %s2060_s27 }
 0xac2   : > { %1134 = vrot.lane.b32.xlu1 %v2517_v25, %s2060_s27 }
 0xaca   : > { %1918 = vrot.lane.b32.xlu1 %v1917_v41, %s2061_s16 }
 0xad2   : > { %1923 = vrot.lane.b32.xlu1 %v1922_v53, %s2061_s16 }
 0xb1c   : > { %v1242_v63 = vpop.permute.xlu1 %1241 }
 0xb1d   : > { %1811 = vmatmul.msk.bf16.vlgmr.msra.gmra.mxu2 %vm569_vm11, %v1242_v63  ;;  %1812 = vmatmul.msk.bf16.vlgmr.msra.gmra.mxu3 %vm569_vm11, %v1242_v63  ;;  %v1927_v63 = vpack.i.bf16 %v2618_v62, %v2615_v57 }
 0xb1f   : > { %1928 = vrot.lane.b32.xlu1 %v1927_v63, %s2061_s16 }
 0xb24   : > { %v749_v17 = vpop.permute.xlu1 %748 }
 0xb25   : > { %752 = vst.msk [vmem:[#allocation3 + $0x4] sm:$0xf] %vm652_vm10, %v749_v17 }
 0xb26   : > { %754 = vst.msk [vmem:[#allocation3 + $0x18] sm:$0xf] %vm655_vm12, %v749_v17  ;;  %v2623_v17 = vld [vmem:[%s2180_s23 + $0x30] sm:$0xff] }
 0xb2c   : > { %v847_v31 = vpop.permute.xlu1 %846 }
 0xb2d   : > { %850 = vst.msk [vmem:[#allocation3 + $0x8] sm:$0xf] %vm652_vm10, %v847_v31 }
 0xb2e   : > { %852 = vst.msk [vmem:[#allocation3 + $0x14] sm:$0xf] %vm655_vm12, %v847_v31  ;;  %v2626_v31 = vld [vmem:[%s2180_s23 + $0x38] sm:$0xff] }
 0xb34   : > { %v1135_v1 = vpop.permute.xlu1 %1134 }
 0xb35   : > { %1137 = vst.msk [vmem:[#allocation3 + $0x14] sm:$0xf] %vm652_vm10, %v1135_v1 }
 0xb36   : > { %1138 = vst.msk [vmem:[#allocation3 + $0x8] sm:$0xf] %vm655_vm12, %v1135_v1  ;;  %v1932_v1 = vpack.i.bf16 %v2626_v31, %v2623_v17 }
 0xb38   : > { %1933 = vrot.lane.b32.xlu1 %v1932_v1, %s2061_s16 }
 0xba0   : > { %v1255_v13 = vpop.f32.mrf.mxu2  ;;  %v1268_v24 = vpop.f32.mrf.mxu3 }
 0xba1   : > { %v1256_v0 = vadd.f32 %v1255_v13, %v1237_v49  ;;  %v1269_v29 = vadd.f32 %v1268_v24, %v1238_v50  ;;  %v1937_v13 = vld [vmem:[%s2711_s5] ss:$0 sm:$0xff] }
 0xba3   : > { %v1813_v25 = vmul.f32 -1.442695, %v1256_v0  ;;  %v1814_v45 = vmul.f32 -1.442695, %v1269_v29 }
 0xba5   : > { %2023 = vpow2.f32 %v1813_v25 }
 0xba8   : > { %v1257_v33 = vpop.f32.mrf.mxu2  ;;  %v1270_v58 = vpop.f32.mrf.mxu3 }
 0xbab   : > { %v2024_v39 = vpop.eup %2023 }
 0xbac   : > { %v1275_v56 = vadd.f32 1.0, %v2024_v39 }
 0xbae   : > { %2025 = vrcp.f32 %v1275_v56  ;;  %v1287_v14 = vand.u32 2147483648, %v1275_v56  ;;  %v1285_v46 = vand.u32 2147483647, %v1275_v56  ;;  %vm1281_vm14 = vweird.f32 %v1275_v56 }
 0xbaf   : > { %2027 = vtanh.f32 %v1269_v29 }
 0xbb0   : > { %v1288_v36 = vor.u32 1.1754944e-38, %v1287_v14  ;;  %vm1286_vm3 = vcmp.eq.f32.partialorder %v1285_v46, 8.507059e+37  ;;  %2029 = vpow2.f32 %v1814_v45 }
 0xbb4   : > { %v2026_v47 = vpop.eup %2025 }
 0xbb5   : > { %v1277_v59 = vmul.f32 %v2026_v47, %v1275_v56  ;;  %vm1282_vm1 = vweird.f32 %v2026_v47  ;;  %v2028_v3 = vpop.eup %2027 }
 0xbb6   : > { %vm1283_vm15 = vmor %vm1281_vm14, %vm1282_vm1  ;;  %v2030_v48 = vpop.eup %2029 }
 0xbb7   : > { %v1278_v9 = vsub.f32 1.0, %v1277_v59  ;;  %v1295_v50 = vadd.f32 1.0, %v2030_v48 }
 0xbb9   : > { %v1279_v42 = vmul.f32 %v2026_v47, %v1278_v9  ;;  %2031 = vrcp.f32 %v1295_v50  ;;  %v1307_v5 = vand.u32 2147483648, %v1295_v50  ;;  %vm1301_vm4 = vweird.f32 %v1295_v50 }
 0xbba   : > { %v1305_v11 = vand.u32 2147483647, %v1295_v50 }
 0xbbb   : > { %v1280_v49 = vadd.f32 %v2026_v47, %v1279_v42  ;;  %v1308_v19 = vor.u32 1.1754944e-38, %v1307_v5 }
 0xbbc   : > { %vm1306_vm6 = vcmp.eq.f32.partialorder %v1305_v11, 8.507059e+37 }
 0xbbd   : > { %v1284_v2 = vsel %vm1283_vm15, %v2026_v47, %v1280_v49 }
 0xbbe   : > { %v1289_v4 = vsel %vm1286_vm3, %v1288_v36, %v1284_v2  ;;  %v1886_v2 = vld [vmem:[%s2712_s6 + $0x8] sm:$0xff] }
 0xbbf   : > { %v1312_v10 = vmul.f32 %v2028_v3, %v1289_v4  ;;  %v2032_v7 = vpop.eup %2031  ;;  %1563 = vmatpush.bf16.msrb.mxu1 %v1886_v2  ;;  %v1885_v3 = vld [vmem:[%s2712_s6] sm:$0xff] }
 0xbc0   : > { %v1297_v20 = vmul.f32 %v2032_v7, %v1295_v50  ;;  %vm1302_vm2 = vweird.f32 %v2032_v7 }
 0xbc1   : > { %1314 = vrot.lane.b32.xlu2 %v1312_v10, %s2060_s27  ;;  %vm1303_vm5 = vmor %vm1301_vm4, %vm1302_vm2  ;;  %v1919_v10 = vpop.permute.xlu1 %1918 }
 0xbc2   : > { %v1298_v18 = vsub.f32 1.0, %v1297_v20  ;;  %v1921_v48 = vunpack.i.h.bf16 %v1919_v10  ;;  %v1920_v50 = vunpack.i.l.bf16 %v1919_v10 }
 0xbc3   : > { %1564 = vmatpush.bf16.msrb.mxu1 %v1885_v3 }
 0xbc4   : > { %v1299_v22 = vmul.f32 %v2032_v7, %v1298_v18 }
 0xbc6   : > { %v1300_v38 = vadd.f32 %v2032_v7, %v1299_v22 }
 0xbc8   : > { %v1304_v15 = vsel %vm1303_vm5, %v2032_v7, %v1300_v38 }
 0xbc9   : > { %1228 = vrot.lane.b32.xlu2 %v1226_v54, %s2060_s27  ;;  %v1309_v30 = vsel %vm1306_vm6, %v1308_v19, %v1304_v15 }
 0xbd1   : > { %944 = vrot.lane.b32.xlu2 %v2483_v34, %s2060_s27  ;;  %v1311_v34 = vmul.f32 %v1289_v4, %v2536_v12 }
 0xc1b   : > { %v1315_v32 = vpop.permute.xlu2 %1314 }
 0xc1c   : > { %v1317_v27 = vadd.f32 %v1315_v32, %v1311_v34  ;;  %v1924_v34 = vpop.permute.xlu1 %1923 }
 0xc1d   : > { %v1925_v38 = vunpack.i.l.bf16 %v1924_v34 }
 0xc1e   : > { %2033 = vtanh.f32 %v1317_v27  ;;  %v1926_v27 = vunpack.i.h.bf16 %v1924_v34 }
 0xc23   : > { %v1229_v23 = vpop.permute.xlu2 %1228 }
 0xc24   : > { %v2034_v35 = vpop.eup %2033  ;;  %1231 = vst.msk [vmem:[#allocation3 + $0x18] sm:$0xf] %vm652_vm10, %v1229_v23 }
 0xc25   : > { %1232 = vst.msk [vmem:[#allocation3 + $0x4] sm:$0xf] %vm655_vm12, %v1229_v23  ;;  %v1319_v37 = vmul.f32 %v2034_v35, %v1309_v30  ;;  %v1929_v30 = vpop.permute.xlu1 %1928 }
 0xc27   : > { %v1320_v26 = vpack.c.bf16 %v1319_v37, %v1319_v37 }
 0xc29   : > { %1322 = vrot.lane.b32.xlu0 %v1320_v26, %s2060_s27  ;;  %v1931_v26 = vunpack.i.h.bf16 %v1929_v30 }
 0xc2b   : > { %v945_v43 = vpop.permute.xlu2 %944 }
 0xc2c   : > { %948 = vst.msk [vmem:[#allocation3 + $0xc] sm:$0xf] %vm652_vm10, %v945_v43 }
 0xc2d   : > { %950 = vst.msk [vmem:[#allocation3 + $0x10] sm:$0xf] %vm655_vm12, %v945_v43  ;;  %v1930_v43 = vunpack.i.l.bf16 %v1929_v30  ;;  %v1934_v41 = vpop.permute.xlu1 %1933 }
 0xc31   : > { %1040 = vrot.lane.b32.xlu0 %v2500_v40, %s2060_s27 }
 0xc9b   : > { %v1323_v12 = vpop.permute.xlu0 %1322 }
 0xc9c   : > { %1325 = vst.msk [vmem:[#allocation3 + $0x1c] sm:$0xf] %vm652_vm10, %v1323_v12 }
 0xc9d   : > { %1326 = vst.msk [vmem:[#allocation3] sm:$0xf] %vm655_vm12, %v1323_v12 }
 0xca3   : > { %v1041_v16 = vpop.permute.xlu0 %1040  ;;  %v1880_v54 = vld [vmem:[#allocation3 + $0x18] sm:$0xff] }
 0xca4   : > { %1043 = vst.msk [vmem:[#allocation3 + $0x10] sm:$0xf] %vm652_vm10, %v1041_v16  ;;  %v1877_v40 = vld [vmem:[#allocation3] sm:$0xff] }
 0xca5   : > { %1044 = vst.msk [vmem:[#allocation3 + $0xc] sm:$0xf] %vm655_vm12, %v1041_v16  ;;  %1847 = vmatmul.msk.bf16.vlgmr.msrb.gmra.mxu0 %vm569_vm11, %v1877_v40 }
 0xcab   : > { %v1879_v55 = vld [vmem:[#allocation3 + $0x10] sm:$0xff] }
 0xcac   : > { %v1878_v61 = vld [vmem:[#allocation3 + $0x8] sm:$0xff] }
 0xcb5   : > { %1848 = vmatmul.msk.bf16.gmra.mxu0 %vm569_vm11, %v1878_v61 }
 0xcc5   : > { %1849 = vmatmul.msk.bf16.gmra.mxu0 %vm569_vm11, %v1879_v55  ;;  %v1936_v55 = vunpack.i.h.bf16 %v1934_v41 }
 0xcd5   : > { %1850 = vmatmul.msk.bf16.gmra.mxu0 %vm569_vm11, %v1880_v54  ;;  %vm1544_vm11 = vcmask 261120   ;;  %v1935_v54 = vunpack.i.l.bf16 %v1934_v41 }
 0xd22   : > { %v1420_v24 = vpop.f32.mrf.mxu0 }
 0xd23   : > { %v1421_v0 = vadd.f32 %v1937_v13, %v1420_v24 }
 0xd25   : > { %1448 = vrot.lane.b32.xlu2 %v1421_v0, %s2062_s20 }
 0xd2a   : > { %v1422_v25 = vpop.f32.mrf.mxu0 }
 0xd2b   : > { %v1423_v33 = vadd.f32 %v1937_v13, %v1422_v25  ;;  %v1938_v25 = vld [vmem:[%s2713_s7] ss:$0 sm:$0xff] }
 0xd2d   : > { %1450 = vrot.lane.b32.xlu0 %v1423_v33, %s2062_s20 }
 0xd32   : > { %v1425_v58 = vpop.f32.mrf.mxu0 }
 0xd33   : > { %v1426_v39 = vadd.f32 %v1937_v13, %v1425_v58 }
 0xd35   : > { %1452 = vrot.lane.b32.xlu2 %v1426_v39, %s2062_s20 }
 0xd3a   : > { %v1427_v56 = vpop.f32.mrf.mxu0 }
 0xd3b   : > { %v1428_v47 = vadd.f32 %v1937_v13, %v1427_v56 }
 0xd3d   : > { %1454 = vrot.lane.b32.xlu0 %v1428_v47, %s2062_s20 }
 0xd42   : > { %v1430_v29 = vpop.f32.mrf.mxu0 }
 0xd43   : > { %v1431_v59 = vadd.f32 %v1937_v13, %v1430_v29 }
 0xd45   : > { %1456 = vrot.lane.b32.xlu2 %v1431_v59, %s2062_s20 }
 0xd4a   : > { %v1432_v9 = vpop.f32.mrf.mxu0 }
 0xd4b   : > { %v1433_v14 = vadd.f32 %v1937_v13, %v1432_v9 }
 0xd4d   : > { %1458 = vrot.lane.b32.xlu0 %v1433_v14, %s2062_s20 }
 0xd52   : > { %v1435_v42 = vpop.f32.mrf.mxu0 }
 0xd53   : > { %v1436_v46 = vadd.f32 %v1937_v13, %v1435_v42 }
 0xd55   : > { %1460 = vrot.lane.b32.xlu2 %v1436_v46, %s2062_s20 }
 0xd5a   : > { %v1437_v49 = vpop.f32.mrf.mxu0 }
 0xd5b   : > { %v1438_v36 = vadd.f32 %v1937_v13, %v1437_v49 }
 0xd5d   : > { %1462 = vrot.lane.b32.xlu0 %v1438_v36, %s2062_s20 }
 0xd7f   : > { %v1449_v4 = vpop.permute.xlu2 %1448 }
 0xd80   : > { %v1472_v45 = vmul.f32 %v1449_v4, %v1421_v0 }
 0xd82   : > { %v1512_v21 = vsel %vm394_vm0, %v1472_v45, %v1920_v50 }
 0xd8f   : > { %v1453_v22 = vpop.permute.xlu2 %1452 }
 0xd90   : > { %v1474_v32 = vmul.f32 %v1453_v22, %v1426_v39 }
 0xd92   : > { %v1514_v15 = vsel %vm394_vm0, %v1474_v32, %v1925_v38 }
 0xd9f   : > { %v1451_v7 = vpop.permute.xlu0 %1450  ;;  %v1457_v35 = vpop.permute.xlu2 %1456 }
 0xda0   : > { %v1473_v20 = vmul.f32 %v1451_v7, %v1423_v33  ;;  %v1476_v37 = vmul.f32 %v1457_v35, %v1431_v59 }
 0xda2   : > { %v1513_v60 = vsel %vm394_vm0, %v1473_v20, %v1921_v48  ;;  %v1516_v12 = vsel %vm394_vm0, %v1476_v37, %v1930_v43 }
 0xda3   : > { %v1520_v18 = vpack.c.bf16 %v1513_v60, %v1512_v21 }
 0xda5   : > { %1859 = vmatmul.msk.bf16.vlgmr.msrb.gmra.mxu1 %vm1544_vm11, %v1520_v18 }
 0xdaf   : > { %v1455_v5 = vpop.permute.xlu0 %1454  ;;  %v1461_v61 = vpop.permute.xlu2 %1460 }
 0xdb0   : > { %v1475_v11 = vmul.f32 %v1455_v5, %v1428_v47  ;;  %v1478_v53 = vmul.f32 %v1461_v61, %v1436_v46 }
 0xdb2   : > { %v1515_v19 = vsel %vm394_vm0, %v1475_v11, %v1926_v27  ;;  %v1518_v13 = vsel %vm394_vm0, %v1478_v53, %v1935_v54 }
 0xdb3   : > { %v1521_v23 = vpack.c.bf16 %v1515_v19, %v1514_v15 }
 0xdb5   : > { %1860 = vmatmul.msk.bf16.gmra.mxu1 %vm1544_vm11, %v1521_v23 }
 0xdbf   : > { %v1459_v44 = vpop.permute.xlu0 %1458 }
 0xdc0   : > { %v1477_v6 = vmul.f32 %v1459_v44, %v1433_v14 }
 0xdc2   : > { %v1517_v16 = vsel %vm394_vm0, %v1477_v6, %v1931_v26 }
 0xdc3   : > { %v1522_v40 = vpack.c.bf16 %v1517_v16, %v1516_v12 }
 0xdc5   : > { %1861 = vmatmul.msk.bf16.gmra.mxu1 %vm1544_vm11, %v1522_v40 }
 0xdcf   : > { %v1463_v63 = vpop.permute.xlu0 %1462 }
 0xdd0   : > { %v1479_v1 = vmul.f32 %v1463_v63, %v1438_v36 }
 0xdd2   : > { %v1519_v24 = vsel %vm394_vm0, %v1479_v1, %v1936_v55 }
 0xdd3   : > { %v1523_v0 = vpack.c.bf16 %v1519_v24, %v1518_v13 }
 0xdd5   : > { %1862 = vmatmul.msk.bf16.gmra.mxu1 %vm1544_vm11, %v1523_v0 }
 0xe22   : > { %v1566_v33 = vpop.f32.mrf.mxu1 }
 0xe23   : > { %v1567_v58 = vadd.f32 %v1938_v25, %v1566_v33 }
 0xe25   : > { %v1586_v39 = vadd.f32 %v1567_v58, %v2597_v8 }
 0xe27   : > { %1594 = vst.msk [vmem:[%s2656_s26] sm:$0xff] %vm394_vm0, %v1586_v39 }
 0xe2a   : > { %v1568_v56 = vpop.f32.mrf.mxu1 }
 0xe2b   : > { %v1569_v47 = vadd.f32 %v1938_v25, %v1568_v56 }
 0xe2d   : > { %v1587_v29 = vadd.f32 %v1569_v47, %v2600_v28 }
 0xe2f   : > { %1595 = vst.msk [vmem:[%s2656_s26 + $0x8] sm:$0xff] %vm394_vm0, %v1587_v29 }
 0xe32   : > { %v1571_v59 = vpop.f32.mrf.mxu1 }
 0xe33   : > { %v1572_v9 = vadd.f32 %v1938_v25, %v1571_v59 }
 0xe35   : > { %v1588_v8 = vadd.f32 %v1572_v9, %v2605_v51 }
 0xe37   : > { %1596 = vst.msk [vmem:[%s2656_s26 + $0x10] sm:$0xff] %vm394_vm0, %v1588_v8 }
 0xe3a   : > { %v1573_v14 = vpop.f32.mrf.mxu1 }
 0xe3b   : > { %v1574_v42 = vadd.f32 %v1938_v25, %v1573_v14 }
 0xe3d   : > { %v1589_v46 = vadd.f32 %v1574_v42, %v2608_v52 }
 0xe3f   : > { %1597 = vst.msk [vmem:[%s2656_s26 + $0x18] sm:$0xff] %vm394_vm0, %v1589_v46 }
 0xe42   : > { %v1576_v49 = vpop.f32.mrf.mxu1 }
 0xe43   : > { %v1577_v36 = vadd.f32 %v1938_v25, %v1576_v49 }
 0xe45   : > { %v1590_v28 = vadd.f32 %v1577_v36, %v2615_v57  ;;  %v1653_v57 = vld [vmem:[%s2656_s26] sm:$0xff] (%p2138_p5) }
 0xe46   : > { %1654 = vst [vmem:[%s1610_s14] sm:$0xff] (%p2138_p5), %v1653_v57 }
 0xe47   : > { %1598 = vst.msk [vmem:[%s2656_s26 + $0x20] sm:$0xff] %vm394_vm0, %v1590_v28 }
 0xe4a   : > { %v1578_v2 = vpop.f32.mrf.mxu1 }
 0xe4b   : > { %v1579_v3 = vadd.f32 %v1938_v25, %v1578_v2 }
 0xe4d   : > { %v1591_v51 = vadd.f32 %v1579_v3, %v2618_v62  ;;  %v1655_v62 = vld [vmem:[%s2656_s26 + $0x8] sm:$0xff] (%p2138_p5) }
 0xe4e   : > { %1656 = vst [vmem:[%s1610_s14 + $0x10] sm:$0xff] (%p2138_p5), %v1655_v62  ;;  %v1661_v7 = vld [vmem:[%s2656_s26 + $0x20] sm:$0xff] (%p2138_p5) }
 0xe4f   : > { %1599 = vst.msk [vmem:[%s2656_s26 + $0x28] sm:$0xff] %vm394_vm0, %v1591_v51 }
 0xe50   : > { %1662 = vst [vmem:[%s1610_s14 + $0x40] sm:$0xff] (%p2138_p5), %v1661_v7 }
 0xe52   : > { %v1581_v4 = vpop.f32.mrf.mxu1 }
 0xe53   : > { %v1582_v10 = vadd.f32 %v1938_v25, %v1581_v4 }
 0xe55   : > { %v1592_v45 = vadd.f32 %v1582_v10, %v2623_v17  ;;  %v1657_v17 = vld [vmem:[%s2656_s26 + $0x10] sm:$0xff] (%p2138_p5) }
 0xe56   : > { %1658 = vst [vmem:[%s1610_s14 + $0x20] sm:$0xff] (%p2138_p5), %v1657_v17  ;;  %v1663_v20 = vld [vmem:[%s2656_s26 + $0x28] sm:$0xff] (%p2138_p5) }
 0xe57   : > { %1600 = vst.msk [vmem:[%s2656_s26 + $0x30] sm:$0xff] %vm394_vm0, %v1592_v45 }
 0xe58   : > { %1664 = vst [vmem:[%s1610_s14 + $0x50] sm:$0xff] (%p2138_p5), %v1663_v20 }
 0xe5a   : > { %v1583_v52 = vpop.f32.mrf.mxu1 }
 0xe5b   : > { %v1584_v48 = vadd.f32 %v1938_v25, %v1583_v52  ;;  %1608 = sbr.rel (!%p2138_p5) target bundleno = 3688 (0xe68), region = 94 }
 0xe5d   : > { %v1593_v50 = vadd.f32 %v1584_v48, %v2626_v31  ;;  %v1659_v31 = vld [vmem:[%s2656_s26 + $0x18] sm:$0xff] (%p2138_p5) }
 0xe5e   : > { %1660 = vst [vmem:[%s1610_s14 + $0x30] sm:$0xff] (%p2138_p5), %v1659_v31  ;;  %v1665_v21 = vld [vmem:[%s2656_s26 + $0x30] sm:$0xff] (%p2138_p5) }
 0xe5f   : > { %1601 = vst.msk [vmem:[%s2656_s26 + $0x38] sm:$0xff] %vm394_vm0, %v1593_v50 }
 0xe60   : > { %1666 = vst [vmem:[%s1610_s14 + $0x60] sm:$0xff] %v1665_v21 }
 0xe66   : > { %v1667_v60 = vld [vmem:[%s2656_s26 + $0x38] sm:$0xff] }
 0xe67   : > { %1668 = vst [vmem:[%s1610_s14 + $0x70] sm:$0xff] %v1667_v60 }
 0xe68 PF: > { %p15_p10 = scmp.ge.s32.totalorder %s2125_s9, 4   ;;  %s2720_s27 = smov %s2053_s28 }
 0xe69   : > { %s2721_s28 = smov %s2136_s12  ;;  %s2722_s29 = smov %s2125_s9 }
 0xe6a   :  { %17 = sbr.rel (!%p15_p10) target bundleno = 2 (0x2), region = 177 }

</bundles_post_ra>
